<compile_context>
chip_gen: v5e
topology: v5e:2x2
jax: 0.10.0
libtpu: 0.0.40
codegen_flags: <defaults>
</compile_context>

<pallas_src>
from functools import partial

import numpy as np
import jax
import jax.numpy as jnp
from jax.experimental import pallas as pl
from jax.experimental.pallas import tpu as pltpu

EPS = 1e-5  # nn.BatchNorm2d default


# ----------------------------------------------------------------------------
# Pallas kernel: 4x (conv + BN + relu) + fc + batch mean, all 2-D matmul/VPU.
# ----------------------------------------------------------------------------
def predictor_kernel(x_ref, m1_ref, mstack_ref, bnp_ref, wfc_ref, fcb_ref,
                     o_ref, *, p_spatial):
    hi = jax.lax.Precision.HIGHEST
    lo = jax.lax.Precision.DEFAULT
    inv_n = 1.0 / x_ref.shape[0]          # 1 / batch
    inv_np = inv_n / p_spatial            # 1 / (batch * pooled pixels)

    cb = bnp_ref[0]                       # (4, PC) conv biases (channel-tiled)
    g = bnp_ref[1]                        # (4, PC) BN gamma    (channel-tiled)
    be = bnp_ref[2]                       # (4, PC) BN beta     (channel-tiled)
    red01 = mstack_ref[3]                 # (PC, PC) {0,1} group-sum + broadcast

    def conv_bn_relu(h, m, layer):
        # 3x3 same-padding conv folded into ONE lane-dense MXU matmul.
        acc = jnp.dot(h, m, preferred_element_type=jnp.float32, precision=hi)
        acc = acc + cb[layer:layer + 1, :]

        # BatchNorm2d training-mode stats (biased), fused: a single 1-pass bf16
        # matmul reduces [sum ; sum-of-squares] over the spatial groups and
        # broadcasts per column.  hi/lo split keeps ~f32 accuracy: red01 is
        # exactly representable in bf16 and s_lo carries the residual bits.
        s1 = jnp.sum(acc, axis=0, keepdims=True)                 # (1, PC)
        s2 = jnp.sum(acc * acc, axis=0, keepdims=True)           # (1, PC)
        stats = jnp.concatenate([s1, s2], axis=0) * inv_np       # (2, PC)
        s_hi = stats.astype(jnp.bfloat16).astype(jnp.float32)    # exact bf16 part
        s_lo = stats - s_hi                                      # exact residual
        red4 = jnp.dot(jnp.concatenate([s_hi, s_lo], axis=0), red01,
                       preferred_element_type=jnp.float32,
                       precision=lo)                             # (4, PC), 1 pass
        mean = red4[0:1, :] + red4[2:3, :]                       # per-channel mean
        ex2 = red4[1:2, :] + red4[3:4, :]                        # per-channel E[x^2]
        var = ex2 - mean * mean                                  # biased batch var

        y = (acc - mean) * jax.lax.rsqrt(var + EPS) * g[layer:layer + 1, :] \
            + be[layer:layer + 1, :]
        return jnp.maximum(y, 0.0)

    h = conv_bn_relu(x_ref[...], m1_ref[...], 0)
    h = conv_bn_relu(h, mstack_ref[0], 1)
    h = conv_bn_relu(h, mstack_ref[1], 2)
    h = conv_bn_relu(h, mstack_ref[2], 3)

    # mean over batch commutes with the linear layer: one (1, PC)@(PC, F).
    h_mean = jnp.sum(h, axis=0, keepdims=True) * inv_n
    o_ref[...] = jnp.dot(h_mean, wfc_ref[...],
                         preferred_element_type=jnp.float32, precision=hi) \
        + fcb_ref[...]


# ----------------------------------------------------------------------------
# Pooling (wrapper-side preprocessing, tiny)
# ----------------------------------------------------------------------------
def _adaptive_max_pool2d_general(x, out_hw):
    """nn.AdaptiveMaxPool2d semantics (floor/ceil bin edges), general case."""
    _, _, H, W = x.shape
    ph, pw = out_hw
    rows = []
    for i in range(ph):
        hs, he = (i * H) // ph, -(-((i + 1) * H) // ph)
        cols = []
        for j in range(pw):
            ws, we = (j * W) // pw, -(-((j + 1) * W) // pw)
            cols.append(jnp.max(x[:, :, hs:he, ws:we], axis=(2, 3)))
        rows.append(jnp.stack(cols, axis=-1))
    return jnp.stack(rows, axis=-2)  # (N, C, ph, pw)


def adaptive_max_pool2d(x, out_hw):
    # TODO(synk): pooling preprocessing stays in glue JAX (tiny reduction).
    n, c, H, W = x.shape
    ph, pw = out_hw
    if H % ph == 0 and W % pw == 0:
        # evenly divisible bins: one fused reshape + max instead of 16 slices.
        return x.reshape(n, c, ph, H // ph, pw, W // pw).max(axis=(3, 5))
    return _adaptive_max_pool2d_general(x, out_hw)


# ----------------------------------------------------------------------------
# One-time weight folding / operand packing (hoisted out of the call path)
# ----------------------------------------------------------------------------
def _shift_basis(ph, pw):
    """S[k] (P, P) 0/1 matrices: S[k, dest, src]=1 for the 3x3 tap k."""
    P = ph * pw
    S = np.zeros((9, P, P), np.float32)
    for k in range(9):
        ky, kx = k // 3, k % 3
        for r in range(ph):
            for c in range(pw):
                rr, cc = r + ky - 1, c + kx - 1
                if 0 <= rr < ph and 0 <= cc < pw:
                    S[k, r * pw + c, rr * pw + cc] = 1.0
    return S


def _fold_conv(w, S):
    """(Co,Ci,3,3) conv weight -> (P*Ci, P*Co) matrix M (exact copy-fold)."""
    w = np.asarray(w, np.float32)
    co, ci, kh, kw = w.shape
    P = S.shape[1]
    wk = np.transpose(w, (2, 3, 1, 0)).reshape(kh * kw, ci, co)   # (9, Ci, Co)
    m = np.einsum('kqp,kio->piqo', S, wk)                         # (P,Ci,P,Co)
    return np.ascontiguousarray(m.reshape(P * ci, P * co))


def prepare_predictor(params, pool_output_size):
    """Fold conv/BN/FC weights into packed kernel constants.  Call ONCE per
    parameter set; the returned arrays are reused for every forward call."""
    ph, pw = pool_output_size
    P = ph * pw
    C = np.asarray(params["w1"]).shape[0]
    F = np.asarray(params["fc_w"]).shape[0]
    S = _shift_basis(ph, pw)

    m1 = _fold_conv(params["w1"], S)                               # (P, P*C)
    red01 = np.kron(np.ones((P, P), np.float32),
                    np.eye(C, dtype=np.float32))                   # (PC, PC) {0,1}
    mstack = np.stack([_fold_conv(params["w2"], S),
                       _fold_conv(params["w3"], S),
                       _fold_conv(params["w4"], S),
                       red01]).astype(np.float32)                  # (4, PC, PC)

    def tile_c(v):                                                 # layout p*C + c
        return np.tile(np.asarray(v, np.float32), P)

    cb = np.stack([tile_c(params[f"b{i}"]) for i in range(1, 5)])  # (4, PC)
    g = np.stack([tile_c(params[f"g{i}"]) for i in range(1, 5)])
    be = np.stack([tile_c(params[f"be{i}"]) for i in range(1, 5)])
    bnp = np.stack([cb, g, be]).astype(np.float32)                 # (3, 4, PC)

    # fc_w[f, c*P + p]  ->  wfc[p*C + c, f]  (matches the kernel column layout)
    fc_w = np.asarray(params["fc_w"], np.float32)
    wfc = np.ascontiguousarray(
        np.transpose(fc_w.reshape(F, C, P), (2, 1, 0)).reshape(P * C, F))
    fcb = np.asarray(params["fc_b"], np.float32).reshape(1, F)

    return {"m1": jnp.asarray(m1), "mstack": jnp.asarray(mstack),
            "bnp": jnp.asarray(bnp), "wfc": jnp.asarray(wfc),
            "fcb": jnp.asarray(fcb)}


# ----------------------------------------------------------------------------
# Forward (jitted per-call path: pooling + one pallas_call)
# ----------------------------------------------------------------------------
@partial(jax.jit, static_argnums=(2,))
def _forward(x, prepared, pool_output_size):
    n, cin, _, _ = x.shape
    assert cin == 1, "conv1 expects a single input channel"
    ph, pw = pool_output_size
    P = ph * pw
    F = prepared["wfc"].shape[1]

    pooled = adaptive_max_pool2d(x, (ph, pw))                  # (N, 1, ph, pw)
    x_cols = pooled.reshape(n, P)                              # (N, P), p = y*pw + x

    # TODO(synk): for large batches, add an N-tiled grid (partial BN stats in
    # VMEM scratch + pl.when finalize, axis marked "parallel" for v7x's two
    # TensorCores); the flat no-grid form is optimal for small N.
    vmem = pl.BlockSpec(memory_space=pltpu.MemorySpace.VMEM)
    return pl.pallas_call(
        partial(predictor_kernel, p_spatial=P),
        out_shape=jax.ShapeDtypeStruct((1, F), jnp.float32),
        in_specs=[vmem] * 6,
        out_specs=vmem,
    )(x_cols, prepared["m1"], prepared["mstack"], prepared["bnp"],
      prepared["wfc"], prepared["fcb"])


def predictor_forward(x, prepared, pool_output_size, output_size=None):
    """Matches PredictorModel.forward(x, output_size); output_size is unused
    by the reference forward (it only returns the batch-averaged chunk)."""
    del output_size
    return _forward(x, prepared, pool_output_size)


# ----------------------------------------------------------------------------
# Pure-JAX reference (for correctness check)
# ----------------------------------------------------------------------------
def reference_forward(x, params, pool_output_size):
    hi = jax.lax.Precision.HIGHEST
    h = adaptive_max_pool2d(x, pool_output_size)
    for i in range(1, 5):
        w, b = params[f"w{i}"], params[f"b{i}"]
        g, be = params[f"g{i}"], params[f"be{i}"]
        h = jax.lax.conv_general_dilated(
            h, w, window_strides=(1, 1), padding=((1, 1), (1, 1)),
            dimension_numbers=("NCHW", "OIHW", "NCHW"), precision=hi)
        h = h + b[None, :, None, None]
        m = jnp.mean(h, axis=(0, 2, 3), keepdims=True)
        v = jnp.mean((h - m) ** 2, axis=(0, 2, 3), keepdims=True)
        h = (h - m) * jax.lax.rsqrt(v + EPS) * g[None, :, None, None] \
            + be[None, :, None, None]
        h = jnp.maximum(h, 0.0)
    flat = h.reshape(h.shape[0], -1)
    pred = jnp.dot(flat, params["fc_w"].T, precision=hi) + params["fc_b"][None, :]
    return jnp.mean(pred, axis=0, keepdims=True)


# ----------------------------------------------------------------------------
# Main
# ----------------------------------------------------------------------------
if __name__ == "__main__":
    N, H, W = 2, 16, 16
    hidden_channels = 8
    pool_output_size = (4, 4)
    fixed_output_size = 32

    C = hidden_channels
    P = pool_output_size[0] * pool_output_size[1]
    F = fixed_output_size

    key = jax.random.PRNGKey(0)
    ks = iter(jax.random.split(key, 32))

    params = {}
    params["w1"] = jax.random.normal(next(ks), (C, 1, 3, 3), jnp.float32) * 0.3
    for i in range(2, 5):
        params[f"w{i}"] = jax.random.normal(next(ks), (C, C, 3, 3), jnp.float32) * 0.2
    for i in range(1, 5):
        params[f"b{i}"] = jax.random.normal(next(ks), (C,), jnp.float32) * 0.1
        params[f"g{i}"] = 1.0 + 0.1 * jax.random.normal(next(ks), (C,), jnp.float32)
        params[f"be{i}"] = 0.1 * jax.random.normal(next(ks), (C,), jnp.float32)
    params["fc_w"] = jax.random.normal(next(ks), (F, C * P), jnp.float32) * 0.1
    params["fc_b"] = jax.random.normal(next(ks), (F,), jnp.float32) * 0.1

    x = jax.random.normal(next(ks), (N, 1, H, W), jnp.float32)

    prepared = prepare_predictor(params, pool_output_size)   # one-time folding

    out = predictor_forward(x, prepared, pool_output_size,
                            output_size=(F,))                # output_size unused, as in torch
    out = jax.block_until_ready(out)

    ref = jax.block_until_ready(reference_forward(x, params, pool_output_size))
    np.testing.assert_allclose(np.asarray(out), np.asarray(ref),
                               rtol=1e-3, atol=1e-3)
    assert out.shape == (1, F)

    print("KERNEL_OK")
</pallas_src>

<mosaic_0001>
module attributes {stable_mosaic.version = 11 : i64} {
  func.func @predictor_kernel(%arg0: memref<2x16xf32, #tpu.memory_space<vmem>>, %arg1: memref<16x128xf32, #tpu.memory_space<vmem>>, %arg2: memref<4x128x128xf32, #tpu.memory_space<vmem>>, %arg3: memref<3x4x128xf32, #tpu.memory_space<vmem>>, %arg4: memref<128x32xf32, #tpu.memory_space<vmem>>, %arg5: memref<1x32xf32, #tpu.memory_space<vmem>>, %arg6: memref<1x32xf32, #tpu.memory_space<vmem>>) attributes {dimension_semantics = [], scalar_prefetch = 0 : i64, scratch_operands = 0 : i64, tpu.core_type = #tpu.core_type<tc>} {
    %c0 = arith.constant 0 : index
    %c0_0 = arith.constant 0 : index
    %c0_1 = arith.constant 0 : index
    %0 = vector.load %arg3[%c0, %c0_0, %c0_1] : memref<3x4x128xf32, #tpu.memory_space<vmem>>, vector<1x4x128xf32>
    %1 = vector.shape_cast %0 : vector<1x4x128xf32> to vector<4x128xf32>
    %c1 = arith.constant 1 : index
    %c0_2 = arith.constant 0 : index
    %c0_3 = arith.constant 0 : index
    %2 = vector.load %arg3[%c1, %c0_2, %c0_3] : memref<3x4x128xf32, #tpu.memory_space<vmem>>, vector<1x4x128xf32>
    %3 = vector.shape_cast %2 : vector<1x4x128xf32> to vector<4x128xf32>
    %c2 = arith.constant 2 : index
    %c0_4 = arith.constant 0 : index
    %c0_5 = arith.constant 0 : index
    %4 = vector.load %arg3[%c2, %c0_4, %c0_5] : memref<3x4x128xf32, #tpu.memory_space<vmem>>, vector<1x4x128xf32>
    %5 = vector.shape_cast %4 : vector<1x4x128xf32> to vector<4x128xf32>
    %c3 = arith.constant 3 : index
    %c0_6 = arith.constant 0 : index
    %c0_7 = arith.constant 0 : index
    %6 = vector.load %arg2[%c3, %c0_6, %c0_7] : memref<4x128x128xf32, #tpu.memory_space<vmem>>, vector<1x128x128xf32>
    %7 = vector.shape_cast %6 : vector<1x128x128xf32> to vector<128x128xf32>
    %c0_8 = arith.constant 0 : index
    %c0_9 = arith.constant 0 : index
    %8 = vector.load %arg0[%c0_8, %c0_9] : memref<2x16xf32, #tpu.memory_space<vmem>>, vector<2x16xf32>
    %c0_10 = arith.constant 0 : index
    %c0_11 = arith.constant 0 : index
    %9 = vector.load %arg1[%c0_10, %c0_11] : memref<16x128xf32, #tpu.memory_space<vmem>>, vector<16x128xf32>
    %cst = arith.constant dense<0.000000e+00> : vector<2x128xf32>
    %10 = tpu.matmul %8, %9, %cst {dimension_numbers = #tpu.dot_dimension_numbers<[1], [0], [0], [1], [0, 0, 1, 1], [], []>, precision = #tpu.contract_precision<fp32>} : vector<2x16xf32>, vector<16x128xf32>, vector<2x128xf32> -> vector<2x128xf32>
    %11 = vector.extract_strided_slice %1 {offsets = [0, 0], sizes = [1, 128], strides = [1, 1]} : vector<4x128xf32> to vector<1x128xf32>
    %12 = vector.broadcast %11 : vector<1x128xf32> to vector<2x128xf32>
    %13 = arith.addf %10, %12 : vector<2x128xf32>
    %cst_12 = arith.constant dense<0.000000e+00> : vector<128xf32>
    %14 = vector.multi_reduction <add>, %13, %cst_12 [0] : vector<2x128xf32> to vector<128xf32>
    %15 = vector.shape_cast %14 : vector<128xf32> to vector<1x128xf32>
    %16 = arith.mulf %13, %13 : vector<2x128xf32>
    %cst_13 = arith.constant dense<0.000000e+00> : vector<128xf32>
    %17 = vector.multi_reduction <add>, %16, %cst_13 [0] : vector<2x128xf32> to vector<128xf32>
    %18 = vector.shape_cast %17 : vector<128xf32> to vector<1x128xf32>
    %19 = tpu.concatenate %15, %18 in 0 : vector<1x128xf32>, vector<1x128xf32> -> vector<2x128xf32>
    %cst_14 = arith.constant 3.125000e-02 : f32
    %20 = vector.broadcast %cst_14 : f32 to vector<2x128xf32>
    %21 = arith.mulf %19, %20 : vector<2x128xf32>
    %22 = arith.truncf %21 : vector<2x128xf32> to vector<2x128xbf16>
    %23 = arith.extf %22 : vector<2x128xbf16> to vector<2x128xf32>
    %24 = arith.subf %21, %23 : vector<2x128xf32>
    %25 = tpu.concatenate %23, %24 in 0 : vector<2x128xf32>, vector<2x128xf32> -> vector<4x128xf32>
    %cst_15 = arith.constant dense<0.000000e+00> : vector<4x128xf32>
    %26 = tpu.matmul %25, %7, %cst_15 {dimension_numbers = #tpu.dot_dimension_numbers<[1], [0], [0], [1], [0, 0, 1, 1], [], []>} : vector<4x128xf32>, vector<128x128xf32>, vector<4x128xf32> -> vector<4x128xf32>
    %27 = vector.extract_strided_slice %26 {offsets = [0, 0], sizes = [1, 128], strides = [1, 1]} : vector<4x128xf32> to vector<1x128xf32>
    %28 = vector.extract_strided_slice %26 {offsets = [2, 0], sizes = [1, 128], strides = [1, 1]} : vector<4x128xf32> to vector<1x128xf32>
    %29 = arith.addf %27, %28 : vector<1x128xf32>
    %30 = vector.extract_strided_slice %26 {offsets = [1, 0], sizes = [1, 128], strides = [1, 1]} : vector<4x128xf32> to vector<1x128xf32>
    %31 = vector.extract_strided_slice %26 {offsets = [3, 0], sizes = [1, 128], strides = [1, 1]} : vector<4x128xf32> to vector<1x128xf32>
    %32 = arith.addf %30, %31 : vector<1x128xf32>
    %33 = arith.mulf %29, %29 : vector<1x128xf32>
    %34 = arith.subf %32, %33 : vector<1x128xf32>
    %35 = vector.broadcast %29 : vector<1x128xf32> to vector<2x128xf32>
    %36 = arith.subf %13, %35 : vector<2x128xf32>
    %cst_16 = arith.constant 9.99999974E-6 : f32
    %37 = vector.broadcast %cst_16 : f32 to vector<1x128xf32>
    %38 = arith.addf %34, %37 : vector<1x128xf32>
    %39 = math.rsqrt %38 : vector<1x128xf32>
    %40 = vector.broadcast %39 : vector<1x128xf32> to vector<2x128xf32>
    %41 = arith.mulf %36, %40 : vector<2x128xf32>
    %42 = vector.extract_strided_slice %3 {offsets = [0, 0], sizes = [1, 128], strides = [1, 1]} : vector<4x128xf32> to vector<1x128xf32>
    %43 = vector.broadcast %42 : vector<1x128xf32> to vector<2x128xf32>
    %44 = arith.mulf %41, %43 : vector<2x128xf32>
    %45 = vector.extract_strided_slice %5 {offsets = [0, 0], sizes = [1, 128], strides = [1, 1]} : vector<4x128xf32> to vector<1x128xf32>
    %46 = vector.broadcast %45 : vector<1x128xf32> to vector<2x128xf32>
    %47 = arith.addf %44, %46 : vector<2x128xf32>
    %cst_17 = arith.constant 0.000000e+00 : f32
    %48 = vector.broadcast %cst_17 : f32 to vector<2x128xf32>
    %49 = arith.maximumf %47, %48 : vector<2x128xf32>
    %c0_18 = arith.constant 0 : index
    %c0_19 = arith.constant 0 : index
    %c0_20 = arith.constant 0 : index
    %50 = vector.load %arg2[%c0_18, %c0_19, %c0_20] : memref<4x128x128xf32, #tpu.memory_space<vmem>>, vector<1x128x128xf32>
    %51 = vector.shape_cast %50 : vector<1x128x128xf32> to vector<128x128xf32>
    %cst_21 = arith.constant dense<0.000000e+00> : vector<2x128xf32>
    %52 = tpu.matmul %49, %51, %cst_21 {dimension_numbers = #tpu.dot_dimension_numbers<[1], [0], [0], [1], [0, 0, 1, 1], [], []>, precision = #tpu.contract_precision<fp32>} : vector<2x128xf32>, vector<128x128xf32>, vector<2x128xf32> -> vector<2x128xf32>
    %53 = vector.extract_strided_slice %1 {offsets = [1, 0], sizes = [1, 128], strides = [1, 1]} : vector<4x128xf32> to vector<1x128xf32>
    %54 = vector.broadcast %53 : vector<1x128xf32> to vector<2x128xf32>
    %55 = arith.addf %52, %54 : vector<2x128xf32>
    %cst_22 = arith.constant dense<0.000000e+00> : vector<128xf32>
    %56 = vector.multi_reduction <add>, %55, %cst_22 [0] : vector<2x128xf32> to vector<128xf32>
    %57 = vector.shape_cast %56 : vector<128xf32> to vector<1x128xf32>
    %58 = arith.mulf %55, %55 : vector<2x128xf32>
    %cst_23 = arith.constant dense<0.000000e+00> : vector<128xf32>
    %59 = vector.multi_reduction <add>, %58, %cst_23 [0] : vector<2x128xf32> to vector<128xf32>
    %60 = vector.shape_cast %59 : vector<128xf32> to vector<1x128xf32>
    %61 = tpu.concatenate %57, %60 in 0 : vector<1x128xf32>, vector<1x128xf32> -> vector<2x128xf32>
    %cst_24 = arith.constant 3.125000e-02 : f32
    %62 = vector.broadcast %cst_24 : f32 to vector<2x128xf32>
    %63 = arith.mulf %61, %62 : vector<2x128xf32>
    %64 = arith.truncf %63 : vector<2x128xf32> to vector<2x128xbf16>
    %65 = arith.extf %64 : vector<2x128xbf16> to vector<2x128xf32>
    %66 = arith.subf %63, %65 : vector<2x128xf32>
    %67 = tpu.concatenate %65, %66 in 0 : vector<2x128xf32>, vector<2x128xf32> -> vector<4x128xf32>
    %cst_25 = arith.constant dense<0.000000e+00> : vector<4x128xf32>
    %68 = tpu.matmul %67, %7, %cst_25 {dimension_numbers = #tpu.dot_dimension_numbers<[1], [0], [0], [1], [0, 0, 1, 1], [], []>} : vector<4x128xf32>, vector<128x128xf32>, vector<4x128xf32> -> vector<4x128xf32>
    %69 = vector.extract_strided_slice %68 {offsets = [0, 0], sizes = [1, 128], strides = [1, 1]} : vector<4x128xf32> to vector<1x128xf32>
    %70 = vector.extract_strided_slice %68 {offsets = [2, 0], sizes = [1, 128], strides = [1, 1]} : vector<4x128xf32> to vector<1x128xf32>
    %71 = arith.addf %69, %70 : vector<1x128xf32>
    %72 = vector.extract_strided_slice %68 {offsets = [1, 0], sizes = [1, 128], strides = [1, 1]} : vector<4x128xf32> to vector<1x128xf32>
    %73 = vector.extract_strided_slice %68 {offsets = [3, 0], sizes = [1, 128], strides = [1, 1]} : vector<4x128xf32> to vector<1x128xf32>
    %74 = arith.addf %72, %73 : vector<1x128xf32>
    %75 = arith.mulf %71, %71 : vector<1x128xf32>
    %76 = arith.subf %74, %75 : vector<1x128xf32>
    %77 = vector.broadcast %71 : vector<1x128xf32> to vector<2x128xf32>
    %78 = arith.subf %55, %77 : vector<2x128xf32>
    %cst_26 = arith.constant 9.99999974E-6 : f32
    %79 = vector.broadcast %cst_26 : f32 to vector<1x128xf32>
    %80 = arith.addf %76, %79 : vector<1x128xf32>
    %81 = math.rsqrt %80 : vector<1x128xf32>
    %82 = vector.broadcast %81 : vector<1x128xf32> to vector<2x128xf32>
    %83 = arith.mulf %78, %82 : vector<2x128xf32>
    %84 = vector.extract_strided_slice %3 {offsets = [1, 0], sizes = [1, 128], strides = [1, 1]} : vector<4x128xf32> to vector<1x128xf32>
    %85 = vector.broadcast %84 : vector<1x128xf32> to vector<2x128xf32>
    %86 = arith.mulf %83, %85 : vector<2x128xf32>
    %87 = vector.extract_strided_slice %5 {offsets = [1, 0], sizes = [1, 128], strides = [1, 1]} : vector<4x128xf32> to vector<1x128xf32>
    %88 = vector.broadcast %87 : vector<1x128xf32> to vector<2x128xf32>
    %89 = arith.addf %86, %88 : vector<2x128xf32>
    %cst_27 = arith.constant 0.000000e+00 : f32
    %90 = vector.broadcast %cst_27 : f32 to vector<2x128xf32>
    %91 = arith.maximumf %89, %90 : vector<2x128xf32>
    %c1_28 = arith.constant 1 : index
    %c0_29 = arith.constant 0 : index
    %c0_30 = arith.constant 0 : index
    %92 = vector.load %arg2[%c1_28, %c0_29, %c0_30] : memref<4x128x128xf32, #tpu.memory_space<vmem>>, vector<1x128x128xf32>
    %93 = vector.shape_cast %92 : vector<1x128x128xf32> to vector<128x128xf32>
    %cst_31 = arith.constant dense<0.000000e+00> : vector<2x128xf32>
    %94 = tpu.matmul %91, %93, %cst_31 {dimension_numbers = #tpu.dot_dimension_numbers<[1], [0], [0], [1], [0, 0, 1, 1], [], []>, precision = #tpu.contract_precision<fp32>} : vector<2x128xf32>, vector<128x128xf32>, vector<2x128xf32> -> vector<2x128xf32>
    %95 = vector.extract_strided_slice %1 {offsets = [2, 0], sizes = [1, 128], strides = [1, 1]} : vector<4x128xf32> to vector<1x128xf32>
    %96 = vector.broadcast %95 : vector<1x128xf32> to vector<2x128xf32>
    %97 = arith.addf %94, %96 : vector<2x128xf32>
    %cst_32 = arith.constant dense<0.000000e+00> : vector<128xf32>
    %98 = vector.multi_reduction <add>, %97, %cst_32 [0] : vector<2x128xf32> to vector<128xf32>
    %99 = vector.shape_cast %98 : vector<128xf32> to vector<1x128xf32>
    %100 = arith.mulf %97, %97 : vector<2x128xf32>
    %cst_33 = arith.constant dense<0.000000e+00> : vector<128xf32>
    %101 = vector.multi_reduction <add>, %100, %cst_33 [0] : vector<2x128xf32> to vector<128xf32>
    %102 = vector.shape_cast %101 : vector<128xf32> to vector<1x128xf32>
    %103 = tpu.concatenate %99, %102 in 0 : vector<1x128xf32>, vector<1x128xf32> -> vector<2x128xf32>
    %cst_34 = arith.constant 3.125000e-02 : f32
    %104 = vector.broadcast %cst_34 : f32 to vector<2x128xf32>
    %105 = arith.mulf %103, %104 : vector<2x128xf32>
    %106 = arith.truncf %105 : vector<2x128xf32> to vector<2x128xbf16>
    %107 = arith.extf %106 : vector<2x128xbf16> to vector<2x128xf32>
    %108 = arith.subf %105, %107 : vector<2x128xf32>
    %109 = tpu.concatenate %107, %108 in 0 : vector<2x128xf32>, vector<2x128xf32> -> vector<4x128xf32>
    %cst_35 = arith.constant dense<0.000000e+00> : vector<4x128xf32>
    %110 = tpu.matmul %109, %7, %cst_35 {dimension_numbers = #tpu.dot_dimension_numbers<[1], [0], [0], [1], [0, 0, 1, 1], [], []>} : vector<4x128xf32>, vector<128x128xf32>, vector<4x128xf32> -> vector<4x128xf32>
    %111 = vector.extract_strided_slice %110 {offsets = [0, 0], sizes = [1, 128], strides = [1, 1]} : vector<4x128xf32> to vector<1x128xf32>
    %112 = vector.extract_strided_slice %110 {offsets = [2, 0], sizes = [1, 128], strides = [1, 1]} : vector<4x128xf32> to vector<1x128xf32>
    %113 = arith.addf %111, %112 : vector<1x128xf32>
    %114 = vector.extract_strided_slice %110 {offsets = [1, 0], sizes = [1, 128], strides = [1, 1]} : vector<4x128xf32> to vector<1x128xf32>
    %115 = vector.extract_strided_slice %110 {offsets = [3, 0], sizes = [1, 128], strides = [1, 1]} : vector<4x128xf32> to vector<1x128xf32>
    %116 = arith.addf %114, %115 : vector<1x128xf32>
    %117 = arith.mulf %113, %113 : vector<1x128xf32>
    %118 = arith.subf %116, %117 : vector<1x128xf32>
    %119 = vector.broadcast %113 : vector<1x128xf32> to vector<2x128xf32>
    %120 = arith.subf %97, %119 : vector<2x128xf32>
    %cst_36 = arith.constant 9.99999974E-6 : f32
    %121 = vector.broadcast %cst_36 : f32 to vector<1x128xf32>
    %122 = arith.addf %118, %121 : vector<1x128xf32>
    %123 = math.rsqrt %122 : vector<1x128xf32>
    %124 = vector.broadcast %123 : vector<1x128xf32> to vector<2x128xf32>
    %125 = arith.mulf %120, %124 : vector<2x128xf32>
    %126 = vector.extract_strided_slice %3 {offsets = [2, 0], sizes = [1, 128], strides = [1, 1]} : vector<4x128xf32> to vector<1x128xf32>
    %127 = vector.broadcast %126 : vector<1x128xf32> to vector<2x128xf32>
    %128 = arith.mulf %125, %127 : vector<2x128xf32>
    %129 = vector.extract_strided_slice %5 {offsets = [2, 0], sizes = [1, 128], strides = [1, 1]} : vector<4x128xf32> to vector<1x128xf32>
    %130 = vector.broadcast %129 : vector<1x128xf32> to vector<2x128xf32>
    %131 = arith.addf %128, %130 : vector<2x128xf32>
    %cst_37 = arith.constant 0.000000e+00 : f32
    %132 = vector.broadcast %cst_37 : f32 to vector<2x128xf32>
    %133 = arith.maximumf %131, %132 : vector<2x128xf32>
    %c2_38 = arith.constant 2 : index
    %c0_39 = arith.constant 0 : index
    %c0_40 = arith.constant 0 : index
    %134 = vector.load %arg2[%c2_38, %c0_39, %c0_40] : memref<4x128x128xf32, #tpu.memory_space<vmem>>, vector<1x128x128xf32>
    %135 = vector.shape_cast %134 : vector<1x128x128xf32> to vector<128x128xf32>
    %cst_41 = arith.constant dense<0.000000e+00> : vector<2x128xf32>
    %136 = tpu.matmul %133, %135, %cst_41 {dimension_numbers = #tpu.dot_dimension_numbers<[1], [0], [0], [1], [0, 0, 1, 1], [], []>, precision = #tpu.contract_precision<fp32>} : vector<2x128xf32>, vector<128x128xf32>, vector<2x128xf32> -> vector<2x128xf32>
    %137 = vector.extract_strided_slice %1 {offsets = [3, 0], sizes = [1, 128], strides = [1, 1]} : vector<4x128xf32> to vector<1x128xf32>
    %138 = vector.broadcast %137 : vector<1x128xf32> to vector<2x128xf32>
    %139 = arith.addf %136, %138 : vector<2x128xf32>
    %cst_42 = arith.constant dense<0.000000e+00> : vector<128xf32>
    %140 = vector.multi_reduction <add>, %139, %cst_42 [0] : vector<2x128xf32> to vector<128xf32>
    %141 = vector.shape_cast %140 : vector<128xf32> to vector<1x128xf32>
    %142 = arith.mulf %139, %139 : vector<2x128xf32>
    %cst_43 = arith.constant dense<0.000000e+00> : vector<128xf32>
    %143 = vector.multi_reduction <add>, %142, %cst_43 [0] : vector<2x128xf32> to vector<128xf32>
    %144 = vector.shape_cast %143 : vector<128xf32> to vector<1x128xf32>
    %145 = tpu.concatenate %141, %144 in 0 : vector<1x128xf32>, vector<1x128xf32> -> vector<2x128xf32>
    %cst_44 = arith.constant 3.125000e-02 : f32
    %146 = vector.broadcast %cst_44 : f32 to vector<2x128xf32>
    %147 = arith.mulf %145, %146 : vector<2x128xf32>
    %148 = arith.truncf %147 : vector<2x128xf32> to vector<2x128xbf16>
    %149 = arith.extf %148 : vector<2x128xbf16> to vector<2x128xf32>
    %150 = arith.subf %147, %149 : vector<2x128xf32>
    %151 = tpu.concatenate %149, %150 in 0 : vector<2x128xf32>, vector<2x128xf32> -> vector<4x128xf32>
    %cst_45 = arith.constant dense<0.000000e+00> : vector<4x128xf32>
    %152 = tpu.matmul %151, %7, %cst_45 {dimension_numbers = #tpu.dot_dimension_numbers<[1], [0], [0], [1], [0, 0, 1, 1], [], []>} : vector<4x128xf32>, vector<128x128xf32>, vector<4x128xf32> -> vector<4x128xf32>
    %153 = vector.extract_strided_slice %152 {offsets = [0, 0], sizes = [1, 128], strides = [1, 1]} : vector<4x128xf32> to vector<1x128xf32>
    %154 = vector.extract_strided_slice %152 {offsets = [2, 0], sizes = [1, 128], strides = [1, 1]} : vector<4x128xf32> to vector<1x128xf32>
    %155 = arith.addf %153, %154 : vector<1x128xf32>
    %156 = vector.extract_strided_slice %152 {offsets = [1, 0], sizes = [1, 128], strides = [1, 1]} : vector<4x128xf32> to vector<1x128xf32>
    %157 = vector.extract_strided_slice %152 {offsets = [3, 0], sizes = [1, 128], strides = [1, 1]} : vector<4x128xf32> to vector<1x128xf32>
    %158 = arith.addf %156, %157 : vector<1x128xf32>
    %159 = arith.mulf %155, %155 : vector<1x128xf32>
    %160 = arith.subf %158, %159 : vector<1x128xf32>
    %161 = vector.broadcast %155 : vector<1x128xf32> to vector<2x128xf32>
    %162 = arith.subf %139, %161 : vector<2x128xf32>
    %cst_46 = arith.constant 9.99999974E-6 : f32
    %163 = vector.broadcast %cst_46 : f32 to vector<1x128xf32>
    %164 = arith.addf %160, %163 : vector<1x128xf32>
    %165 = math.rsqrt %164 : vector<1x128xf32>
    %166 = vector.broadcast %165 : vector<1x128xf32> to vector<2x128xf32>
    %167 = arith.mulf %162, %166 : vector<2x128xf32>
    %168 = vector.extract_strided_slice %3 {offsets = [3, 0], sizes = [1, 128], strides = [1, 1]} : vector<4x128xf32> to vector<1x128xf32>
    %169 = vector.broadcast %168 : vector<1x128xf32> to vector<2x128xf32>
    %170 = arith.mulf %167, %169 : vector<2x128xf32>
    %171 = vector.extract_strided_slice %5 {offsets = [3, 0], sizes = [1, 128], strides = [1, 1]} : vector<4x128xf32> to vector<1x128xf32>
    %172 = vector.broadcast %171 : vector<1x128xf32> to vector<2x128xf32>
    %173 = arith.addf %170, %172 : vector<2x128xf32>
    %cst_47 = arith.constant 0.000000e+00 : f32
    %174 = vector.broadcast %cst_47 : f32 to vector<2x128xf32>
    %175 = arith.maximumf %173, %174 : vector<2x128xf32>
    %cst_48 = arith.constant dense<0.000000e+00> : vector<128xf32>
    %176 = vector.multi_reduction <add>, %175, %cst_48 [0] : vector<2x128xf32> to vector<128xf32>
    %177 = vector.shape_cast %176 : vector<128xf32> to vector<1x128xf32>
    %cst_49 = arith.constant 5.000000e-01 : f32
    %178 = vector.broadcast %cst_49 : f32 to vector<1x128xf32>
    %179 = arith.mulf %177, %178 : vector<1x128xf32>
    %c0_50 = arith.constant 0 : index
    %c0_51 = arith.constant 0 : index
    %180 = vector.load %arg4[%c0_50, %c0_51] : memref<128x32xf32, #tpu.memory_space<vmem>>, vector<128x32xf32>
    %cst_52 = arith.constant dense<0.000000e+00> : vector<1x32xf32>
    %181 = tpu.matmul %179, %180, %cst_52 {dimension_numbers = #tpu.dot_dimension_numbers<[1], [0], [0], [1], [0, 0, 1, 1], [], []>, precision = #tpu.contract_precision<fp32>} : vector<1x128xf32>, vector<128x32xf32>, vector<1x32xf32> -> vector<1x32xf32>
    %c0_53 = arith.constant 0 : index
    %c0_54 = arith.constant 0 : index
    %182 = vector.load %arg5[%c0_53, %c0_54] : memref<1x32xf32, #tpu.memory_space<vmem>>, vector<1x32xf32>
    %183 = arith.addf %181, %182 : vector<1x32xf32>
    %c0_55 = arith.constant 0 : index
    %c0_56 = arith.constant 0 : index
    %184 = vector.load %arg6[%c0_55, %c0_56] : memref<1x32xf32, #tpu.memory_space<vmem>>, vector<1x32xf32>
    tpu.vector_store %arg6[%c0_55, %c0_56], %183 {strides = array<i32>} : memref<1x32xf32, #tpu.memory_space<vmem>>, vector<1x32xf32>,
    return
  }
}

</mosaic_0001>

<bundles_post_ra>
// kernel: _forward.1
= control target key start
LH: loop header
LB: loop body
LE: loop exit
PB: predicated region body
PF: predicated region fallthrough
CT: control target
= control target key end

     0   :  { %11 = vsyncpa [#allocation3], 0  ;;  %s3307_s0 = inlined_call_operand.vmem [shape: f32[2,16], index: 0, kind: input, shape index: {}]   ;;  %s3308_s1 = inlined_call_operand.vmem [shape: f32[16,128], index: 1, kind: input, shape index: {}]   ;;  %s3309_s2 = inlined_call_operand.hbm [shape: f32[4,128,128], index: 2, kind: input, shape index: {}]   ;;  %s3310_s3 = inlined_call_operand.vmem [shape: f32[3,4,128], index: 3, kind: input, shape index: {}]   ;;  %s3311_s4 = inlined_call_operand.vmem [shape: f32[128,32], index: 4, kind: input, shape index: {}]   ;;  %s3312_s5 = inlined_call_operand.vmem [shape: f32[1,32], index: 5, kind: input, shape index: {}]   ;;  %s3313_s6 = inlined_call_operand.hbm [shape: f32[1,32], index: 6, kind: output, shape index: {}]  }
   0x1   :  { %12 = vsyncpa [#allocation4], 0  ;;  %s21_s23 = sshll.u32 %s3309_s2, 4  ;;  %s2069_s24 = smov [#allocation2]   ;;  %s22_s23 = int_to_ptr.hbm [resolvable:$true] %s21_s23 }
   0x2   :  { %s23_s25 = sshll.u32 %s2069_s24, 4  ;;  %s2070_s26 = smov 128   ;;  %s24_s25 = int_to_ptr.vmem [resolvable:$true] %s23_s25 }
   0x3   :  { %s2071_s27 = smov 8  }
   0x4   :  { %29 = dma.hbm_to_vmem [thread:$0]  %s22_s23, 8192, %s24_s25, [#allocation3], %s2070_s26, %s2070_s26, %s2071_s27  }
   0x5   :  { %2065 = dma.done.wait [#allocation3], 8192  }
   0x6   :  { %2066 = vsyncadd [#allocation3], 4294959104  ;;  %vm66_vm0 = vcmask 130048   ;;  %v64_v0 = vld [vmem:[%s3308_s1 + $0x8] sm:$0xff]  ;;  %v63_v1 = vld [vmem:[%s3308_s1] sm:$0xff]  ;;  %vm229_vm1 = vcmask 1041408  }
   0x7   :  { %v62_v2 = vld [vmem:[%s3307_s0] sm:$0x3]  ;;  %v84_v3 = vand.u32 4294901760, %v64_v0  ;;  %v86_v4 = vand.u32 4294901760, %v63_v1  ;;  %v2120_v19 = vld [vmem:[#allocation2 + $0x1f8] sm:$0xff]  ;;  %v2123_v20 = vld [vmem:[#allocation2 + $0x1f0] sm:$0xff] }
   0x8   :  { %v68_v5 = vsel %vm66_vm0, %v62_v2, 0  ;;  %v2126_v21 = vld [vmem:[#allocation2 + $0x1e8] sm:$0xff]  ;;  %v2129_v22 = vld [vmem:[#allocation2 + $0x1e0] sm:$0xff]  ;;  %v2132_v23 = vld [vmem:[#allocation2 + $0x1d8] sm:$0xff]  ;;  %vm245_vm2 = vcmask 1040384   ;;  %s2072_s23 = smov [#allocation5]  }
   0x9   :  { %v88_v6 = vand.u32 4294901760, %v68_v5  ;;  %v112_v7 = vsub.f32 %v64_v0, %v84_v3  ;;  %85 = vmatpush.msra.mxu0 %v84_v3  ;;  %v118_v8 = vsub.f32 %v63_v1, %v86_v4  ;;  %169 = vmatpush.msra.mxu3 %v84_v3  ;;  %v2135_v24 = vld [vmem:[#allocation2 + $0x1d0] sm:$0xff]  ;;  %v2138_v25 = vld [vmem:[#allocation2 + $0x1c8] sm:$0xff]  ;;  %v2141_v26 = vld [vmem:[#allocation2 + $0x1c0] sm:$0xff]  ;;  %s1972_s24 = sshll.u32 %s2072_s23, 4  ;;  %s1974_s27 = sshll.u32 %s3313_s6, 4  ;;  %s1973_s24 = int_to_ptr.vmem [resolvable:$true] %s1972_s24  ;;  %s1975_s27 = int_to_ptr.hbm [resolvable:$true] %s1974_s27 }
   0xa   :  { %v2144_v27 = vld [vmem:[#allocation2 + $0x1b8] sm:$0xff]  ;;  %v2150_v28 = vld [vmem:[%s3310_s3] sm:$0xf]  ;;  %v2152_v29 = vld [vmem:[#allocation2 + $0x1b0] sm:$0xff]  ;;  %vm1965_vm15 = vcmask 253952  }
   0xb   :  { %v89_v9 = vsub.f32 %v68_v5, %v88_v6  ;;  %144 = vmatpush.msra.mxu2 %v112_v7  ;;  %87 = vmatpush.msra.mxu0 %v86_v4  ;;  %v113_v10 = vand.u32 4294901760, %v112_v7  ;;  %v119_v11 = vand.u32 4294901760, %v118_v8  ;;  %v2154_v30 = vld [vmem:[#allocation2 + $0x1a8] sm:$0xff]  ;;  %v2157_v31 = vld [vmem:[#allocation2 + $0x1a0] sm:$0xff]  ;;  %v65_v32 = vperm.slane %v2150_v28, 0  ;;  %v2161_v33 = vld [vmem:[#allocation2 + $0x198] sm:$0xff] }
   0xc   :  { %171 = vmatpush.msra.mxu3 %v86_v4  ;;  %v2164_v35 = vld [vmem:[#allocation2 + $0x190] sm:$0xff]  ;;  %v2167_v39 = vld [vmem:[#allocation2 + $0x188] sm:$0xff]  ;;  %v2170_v42 = vld [vmem:[#allocation2 + $0x180] sm:$0xff] }
   0xd   :  { %v90_v12 = vand.u32 4294901760, %v89_v9  ;;  %147 = vmatpush.msra.mxu2 %v118_v8  ;;  %v114_v13 = vsub.f32 %v112_v7, %v113_v10  ;;  %196 = vmatpush.msrb.mxu0 %v113_v10  ;;  %v120_v14 = vsub.f32 %v118_v8, %v119_v11  ;;  %v319_v46 = vld [vmem:[#allocation2 + $0x78] sm:$0xff]  ;;  %v318_v47 = vld [vmem:[#allocation2 + $0x70] sm:$0xff]  ;;  %v317_v48 = vld [vmem:[#allocation2 + $0x68] sm:$0xff] }
   0xe   :  { %150 = vmatmul.f32.vlgmr.msra.gmra.mxu2 %v89_v9  ;;  %v2174_v50 = vand.u32 4294901760, %v319_v46  ;;  %v2176_v51 = vand.u32 4294901760, %v318_v47  ;;  %v2178_v52 = vand.u32 4294901760, %v317_v48  ;;  %v316_v53 = vld [vmem:[#allocation2 + $0x60] sm:$0xff]  ;;  %v315_v54 = vld [vmem:[#allocation2 + $0x58] sm:$0xff]  ;;  %v314_v55 = vld [vmem:[#allocation2 + $0x50] sm:$0xff] }
   0xf   :  { %v91_v15 = vsub.f32 %v89_v9, %v90_v12  ;;  %175 = vmatmul.f32.vlgmr.msra.gmra.mxu3 %v90_v12  ;;  %v115_v16 = vand.u32 4294901760, %v114_v13  ;;  %v121_v17 = vand.u32 4294901760, %v120_v14  ;;  %200 = vmatpush.msrb.mxu0 %v119_v11  ;;  %v2180_v57 = vand.u32 4294901760, %v316_v53 }
  0x10   :  { %255 = vmatpush.msrb.mxu2 %v2120_v19  ;;  %v2182_v58 = vand.u32 4294901760, %v315_v54  ;;  %v2184_v59 = vand.u32 4294901760, %v314_v55  ;;  %v2189_v61 = vsub.f32 %v319_v46, %v2174_v50  ;;  %v2192_v62 = vsub.f32 %v318_v47, %v2176_v51  ;;  %322 = vmatpush.msrb.mxu3 %v2174_v50 }
  0x11   :  { %v92_v18 = vand.u32 4294901760, %v91_v15  ;;  %116 = vmatpush.msra.mxu1 %v115_v16  ;;  %v2195_v63 = vsub.f32 %v317_v48, %v2178_v52  ;;  %v2199_v0 = vsub.f32 %v316_v53, %v2180_v57 }
  0x12   :  { %256 = vmatpush.msrb.mxu2 %v2123_v20  ;;  %v2202_v1 = vsub.f32 %v315_v54, %v2182_v58  ;;  %v2205_v2 = vsub.f32 %v314_v55, %v2184_v59  ;;  %v364_v5 = vand.u32 4294901760, %v2189_v61  ;;  %324 = vmatpush.msrb.mxu3 %v2176_v51 }
  0x13   :  { %93 = vmatmul.f32.vlgmr.msra.gmra.mxu0 %v92_v18  ;;  %122 = vmatpush.msra.mxu1 %v121_v17  ;;  %v376_v8 = vand.u32 4294901760, %v2195_v63  ;;  %v382_v9 = vand.u32 4294901760, %v2199_v0 }
  0x14   :  { %124 = vmatmul.f32.vlgmr.msra.gmra.mxu1 %v88_v6  ;;  %257 = vmatpush.msrb.mxu2 %v2126_v21  ;;  %v365_v11 = vsub.f32 %v2189_v61, %v364_v5  ;;  %v388_v13 = vand.u32 4294901760, %v2202_v1 }
  0x15   :  { %221 = vmatpush.msrb.mxu1 %v84_v3  ;;  %326 = vmatpush.msrb.mxu3 %v2178_v52  ;;  %v377_v16 = vsub.f32 %v2195_v63, %v376_v8 }
  0x16   :  { %258 = vmatpush.msrb.mxu2 %v2129_v22  ;;  %v366_v17 = vand.u32 4294901760, %v365_v11 }
  0x17   :  { %223 = vmatpush.msrb.mxu1 %v86_v4  ;;  %328 = vmatpush.msrb.mxu3 %v2180_v57 }
  0x18   :  { %259 = vmatpush.msrb.mxu2 %v2132_v23  ;;  %367 = vmatpush.msra.mxu0 %v366_v17 }
  0x19   :  { %465 = vmatpush.msra.mxu1 %v2189_v61  ;;  %330 = vmatpush.msrb.mxu3 %v2182_v58 }
  0x1a   :  { %260 = vmatpush.msrb.mxu2 %v2135_v24 }
  0x1b   :  { %202 = vmatmul.f32.vlgmr.msrb.gmra.mxu0 %v88_v6  ;;  %468 = vmatpush.msra.mxu1 %v2192_v62 }
  0x1c   :  { %225 = vmatmul.f32.vlgmr.msrb.gmra.mxu1 %v88_v6  ;;  %261 = vmatpush.msrb.mxu2 %v2138_v25  ;;  %v370_v6 = vand.u32 4294901760, %v2192_v62 }
  0x1d   :  { %471 = vmatpush.msra.mxu1 %v2195_v63  ;;  %332 = vmatpush.msrb.mxu3 %v2184_v59 }
  0x1e   :  { %262 = vmatpush.msrb.mxu2 %v2141_v26  ;;  %v371_v12 = vsub.f32 %v2192_v62, %v370_v6 }
  0x1f   :  { %474 = vmatpush.msra.mxu1 %v2199_v0 }
  0x20   :  { %263 = vmatpush.msrb.mxu2 %v2144_v27  ;;  %v372_v18 = vand.u32 4294901760, %v371_v12 }
  0x21   :  { %477 = vmatpush.msra.mxu1 %v2202_v1 }
  0x22   :  { %264 = vmatpush.msrb.mxu2 %v2152_v29  ;;  %373 = vmatpush.msra.mxu0 %v372_v18 }
  0x23   :  { %480 = vmatpush.msra.mxu1 %v2205_v2 }
  0x24   :  { %265 = vmatpush.msrb.mxu2 %v2154_v30 }
  0x26   :  { %266 = vmatpush.msrb.mxu2 %v2157_v31 }
  0x28   :  { %267 = vmatpush.msrb.mxu2 %v2161_v33 }
  0x2a   :  { %268 = vmatpush.msrb.mxu2 %v2164_v35 }
  0x2c   :  { %269 = vmatpush.msrb.mxu2 %v2167_v39 }
  0x2e   :  { %270 = vmatpush.msrb.mxu2 %v2170_v42 }
  0x30   :  { %518 = vmatpush.msra.mxu2 %v2174_v50 }
  0x32   :  { %520 = vmatpush.msra.mxu2 %v2176_v51 }
  0x34   :  { %522 = vmatpush.msra.mxu2 %v2178_v52 }
  0x36   :  { %524 = vmatpush.msra.mxu2 %v2180_v57 }
  0x38   :  { %526 = vmatpush.msra.mxu2 %v2182_v58 }
  0x3a   :  { %528 = vmatpush.msra.mxu2 %v2184_v59 }
  0x90   :  { %v94_v34 = vpop.f32.mrf.mxu0 }
  0x91   :  { %v95_v36 = vadd.f32 %v94_v34, %v65_v32  ;;  %v125_v37 = vpop.f32.mrf.mxu1  ;;  %v151_v38 = vpop.f32.mrf.mxu2  ;;  %v383_v32 = vsub.f32 %v2199_v0, %v382_v9  ;;  %v3320_v34 = vand.u32 4294901760, %v2205_v2 }
  0x92   :  { %v176_v41 = vpop.f32.mrf.mxu3 }
  0x93   :  { %v126_v40 = vadd.f32 %v125_v37, %v95_v36 }
  0x95   :  { %v152_v43 = vadd.f32 %v151_v38, %v126_v40  ;;  %v378_v38 = vand.u32 4294901760, %v377_v16  ;;  %v389_v40 = vsub.f32 %v2202_v1, %v388_v13  ;;  %v312_v16 = vld [vmem:[#allocation2 + $0x40] sm:$0xff]  ;;  %v2439_v1 = vld [vmem:[%s3310_s3 + $0x8] sm:$0xf] }
  0x96   :  { %v2260_v18 = vand.u32 4294901760, %v312_v16 }
  0x97   :  { %v177_v44 = vadd.f32 %v176_v41, %v152_v43  ;;  %379 = vmatpush.msra.mxu0 %v378_v38  ;;  %v390_v48 = vand.u32 4294901760, %v389_v40  ;;  %v310_v40 = vld [vmem:[#allocation2 + $0x30] sm:$0xff] }
  0x98   :  { %v203_v45 = vpop.f32.mrf.mxu0 }
  0x99   :  { %v204_v49 = vadd.f32 %v203_v45, %v177_v44  ;;  %v226_v56 = vpop.f32.mrf.mxu1  ;;  %v384_v44 = vand.u32 4294901760, %v383_v32  ;;  %v395_v45 = vsub.f32 %v2205_v2, %v3320_v34  ;;  %v311_v32 = vld [vmem:[#allocation2 + $0x38] sm:$0xff] }
  0x9a   :  { %v2268_v38 = vand.u32 4294901760, %v311_v32 }
  0x9b   :  { %v2186_v60 = vadd.f32 %v226_v56, %v204_v49  ;;  %385 = vmatpush.msra.mxu0 %v384_v44  ;;  %v396_v53 = vand.u32 4294901760, %v395_v45  ;;  %v2280_v45 = vand.u32 4294901760, %v310_v40 }
  0x9c   :  { %v2278_v44 = vsub.f32 %v311_v32, %v2268_v38 }
  0x9d   :  { %v230_v3 = vsel %vm229_vm1, %v2186_v60, 0.0  ;;  %v237_v4 = vmul.f32 %v2186_v60, %v2186_v60  ;;  %391 = vmatpush.msra.mxu0 %v390_v48 }
  0x9e   :  { %v231_v7 = vrot.slane %v230_v3, 4 }
  0x9f   :  { %v238_v10 = vsel %vm229_vm1, %v237_v4, 0.0  ;;  %397 = vmatpush.msra.mxu0 %v396_v53  ;;  %v2290_v53 = vsub.f32 %v310_v40, %v2280_v45 }
  0xa0   :  { %v232_v14 = vadd.f32 %v231_v7, %v230_v3  ;;  %v239_v15 = vrot.slane %v238_v10, 4 }
  0xa2   :  { %v233_v36 = vrot.slane %v232_v14, 2  ;;  %v240_v37 = vadd.f32 %v239_v15, %v238_v10 }
  0xa4   :  { %v234_v41 = vadd.f32 %v233_v36, %v232_v14  ;;  %v241_v43 = vrot.slane %v240_v37, 2  ;;  %v313_v14 = vld [vmem:[#allocation2 + $0x48] sm:$0xff] }
  0xa5   :  { %v2255_v15 = vand.u32 4294901760, %v313_v14 }
  0xa6   :  { %v235_v46 = vrot.slane %v234_v41, 1  ;;  %v242_v47 = vadd.f32 %v241_v43, %v240_v37  ;;  %v2266_v37 = vsub.f32 %v312_v16, %v2260_v18 }
  0xa7   :  { %v2258_v17 = vsub.f32 %v313_v14, %v2255_v15  ;;  %334 = vmatpush.msrb.mxu3 %v2255_v15  ;;  %530 = vmatpush.msra.mxu2 %v2255_v15 }
  0xa8   :  { %v243_v49 = vrot.slane %v242_v47, 1  ;;  %v236_v54 = vadd.f32 %v235_v46, %v234_v41  ;;  %v3318_v43 = vand.u32 4294901760, %v2266_v37  ;;  %v309_v46 = vld [vmem:[#allocation2 + $0x28] sm:$0xff] }
  0xa9   :  { %v3319_v36 = vand.u32 4294901760, %v2258_v17  ;;  %336 = vmatpush.msrb.mxu3 %v2260_v18  ;;  %483 = vmatpush.msra.mxu1 %v2258_v17 }
  0xaa   :  { %v244_v55 = vadd.f32 %v243_v49, %v242_v47  ;;  %532 = vmatpush.msra.mxu2 %v2260_v18  ;;  %v407_v48 = vsub.f32 %v2266_v37, %v3318_v43  ;;  %v3316_v49 = vand.u32 4294901760, %v2278_v44 }
  0xab   :  { %v401_v41 = vsub.f32 %v2258_v17, %v3319_v36  ;;  %338 = vmatpush.msrb.mxu3 %v2268_v38  ;;  %486 = vmatpush.msra.mxu1 %v2266_v37 }
  0xac   :  { %v246_v56 = vsel %vm245_vm2, %v236_v54, %v244_v55  ;;  %534 = vmatpush.msra.mxu2 %v2268_v38  ;;  %v2294_v54 = vand.u32 4294901760, %v309_v46  ;;  %v308_v55 = vld [vmem:[#allocation2 + $0x20] sm:$0xff] }
  0xad   :  { %v247_v3 = vmul.f32 0.03125, %v246_v56  ;;  %v402_v47 = vand.u32 4294901760, %v401_v41  ;;  %340 = vmatpush.msrb.mxu3 %v2280_v45  ;;  %489 = vmatpush.msra.mxu1 %v2278_v44  ;;  %v408_v56 = vand.u32 4294901760, %v407_v48  ;;  %v306_v41 = vld [vmem:[#allocation2 + $0x10] sm:$0xff] }
  0xae   :  { %536 = vmatpush.msra.mxu2 %v2280_v45 }
  0xaf   :  { %v248_v4 = vpack.c.bf16 %v247_v3, %v247_v3  ;;  %403 = vmatpush.msra.mxu0 %v402_v47  ;;  %492 = vmatpush.msra.mxu1 %v2290_v53 }
  0xb0   :  { %342 = vmatpush.msrb.mxu3 %v2294_v54  ;;  %538 = vmatpush.msra.mxu2 %v2294_v54 }
  0xb1   :  { %v249_v7 = vunpack.c.l.bf16 %v248_v4  ;;  %v3314_v4 = vand.u32 4294901760, %v2290_v53  ;;  %409 = vmatpush.msra.mxu0 %v408_v56  ;;  %v2324_v56 = vand.u32 4294901760, %v306_v41 }
  0xb3   :  { %v250_v10 = vsub.f32 %v247_v3, %v249_v7  ;;  %v413_v3 = vsub.f32 %v2278_v44, %v3316_v49  ;;  %v419_v14 = vsub.f32 %v2290_v53, %v3314_v4  ;;  %v304_v49 = vld [vmem:[#allocation2] sm:$0xff] }
  0xb4   :  { %v2352_v36 = vand.u32 4294901760, %v304_v49 }
  0xb5   :  { %v252_v11 = vrot.slane %v250_v10, 6  ;;  %v2305_v10 = vsub.f32 %v309_v46, %v2294_v54  ;;  %v420_v46 = vand.u32 4294901760, %v419_v14  ;;  %v2337_v14 = vsub.f32 %v306_v41, %v2324_v56 }
  0xb7   :  { %v254_v12 = vsel %vm229_vm1, %v249_v7, %v252_v11  ;;  %v2301_v7 = vand.u32 4294901760, %v308_v55  ;;  %v307_v11 = vld [vmem:[#allocation2 + $0x18] sm:$0xff]  ;;  %v3315_v40 = vand.u32 4294901760, %v2305_v10  ;;  %495 = vmatpush.msra.mxu1 %v2305_v10  ;;  %v3322_v43 = vand.u32 4294901760, %v2337_v14 }
  0xb8   :  { %271 = vmatmul.f32.vlgmr.msrb.gmra.mxu2 %v254_v12  ;;  %v414_v12 = vand.u32 4294901760, %v413_v3  ;;  %v2315_v32 = vand.u32 4294901760, %v307_v11  ;;  %v305_v3 = vld [vmem:[#allocation2 + $0x8] sm:$0xff] }
  0xb9   :  { %v2313_v16 = vsub.f32 %v308_v55, %v2301_v7  ;;  %344 = vmatpush.msrb.mxu3 %v2301_v7  ;;  %540 = vmatpush.msra.mxu2 %v2301_v7  ;;  %v425_v55 = vsub.f32 %v2305_v10, %v3315_v40  ;;  %v2339_v4 = vand.u32 4294901760, %v305_v3 }
  0xba   :  { %415 = vmatpush.msra.mxu0 %v414_v12  ;;  %v2322_v48 = vsub.f32 %v307_v11, %v2315_v32 }
  0xbb   :  { %v3317_v47 = vand.u32 4294901760, %v2313_v16  ;;  %346 = vmatpush.msrb.mxu3 %v2315_v32  ;;  %498 = vmatpush.msra.mxu1 %v2313_v16  ;;  %v426_v40 = vand.u32 4294901760, %v425_v55  ;;  %v2349_v41 = vsub.f32 %v305_v3, %v2339_v4  ;;  %v2362_v3 = vsub.f32 %v304_v49, %v2352_v36 }
  0xbc   :  { %421 = vmatpush.msra.mxu0 %v420_v46  ;;  %v3321_v11 = vand.u32 4294901760, %v2322_v48  ;;  %542 = vmatpush.msra.mxu2 %v2315_v32 }
  0xbd   :  { %v431_v12 = vsub.f32 %v2313_v16, %v3317_v47  ;;  %348 = vmatpush.msrb.mxu3 %v2324_v56  ;;  %501 = vmatpush.msra.mxu1 %v2322_v48  ;;  %v448_v34 = vand.u32 4294901760, %v2349_v41 }
  0xbe   :  { %v437_v47 = vsub.f32 %v2322_v48, %v3321_v11  ;;  %544 = vmatpush.msra.mxu2 %v2324_v56  ;;  %427 = vmatpush.msra.mxu0 %v426_v40 }
  0xbf   :  { %v432_v46 = vand.u32 4294901760, %v431_v12  ;;  %350 = vmatpush.msrb.mxu3 %v2339_v4  ;;  %v443_v12 = vsub.f32 %v2337_v14, %v3322_v43  ;;  %504 = vmatpush.msra.mxu1 %v2337_v14  ;;  %v449_v11 = vsub.f32 %v2349_v41, %v448_v34 }
  0xc0   :  { %v438_v55 = vand.u32 4294901760, %v437_v47  ;;  %546 = vmatpush.msra.mxu2 %v2339_v4  ;;  %v454_v47 = vand.u32 4294901760, %v2362_v3 }
  0xc1   :  { %433 = vmatpush.msra.mxu0 %v432_v46  ;;  %352 = vmatpush.msrb.mxu3 %v2352_v36  ;;  %v444_v40 = vand.u32 4294901760, %v443_v12  ;;  %v450_v43 = vand.u32 4294901760, %v449_v11  ;;  %v746_v12 = vld [vmem:[#allocation2 + $0xd0] sm:$0xff] }
  0xc2   :  { %507 = vmatpush.msra.mxu1 %v2349_v41  ;;  %548 = vmatpush.msra.mxu2 %v2352_v36  ;;  %v455_v49 = vsub.f32 %v2362_v3, %v454_v47 }
  0xc3   :  { %559 = vmatpush.msra.mxu3 %v364_v5  ;;  %439 = vmatpush.msra.mxu0 %v438_v55  ;;  %v747_v55 = vld [vmem:[#allocation2 + $0xd8] sm:$0xff] }
  0xc4   :  { %510 = vmatpush.msra.mxu1 %v2362_v3  ;;  %v456_v61 = vand.u32 4294901760, %v455_v49  ;;  %v2455_v49 = vand.u32 4294901760, %v746_v12 }
  0xc5   :  { %563 = vmatpush.msra.mxu3 %v370_v6  ;;  %445 = vmatpush.msra.mxu0 %v444_v40 }
  0xc6   :  { %686 = vmatpush.msrb.mxu1 %v2120_v19  ;;  %v3332_v19 = vand.u32 4294901760, %v2205_v2 }
  0xc7   :  { %567 = vmatpush.msra.mxu3 %v376_v8  ;;  %451 = vmatpush.msra.mxu0 %v450_v43 }
  0xc8   :  { %687 = vmatpush.msrb.mxu1 %v2123_v20  ;;  %v3333_v20 = vand.u32 4294901760, %v2258_v17 }
  0xc9   :  { %571 = vmatpush.msra.mxu3 %v382_v9  ;;  %457 = vmatpush.msra.mxu0 %v456_v61  ;;  %v301_v9 = vperm.slane %v2439_v1, 0 }
  0xca   :  { %688 = vmatpush.msrb.mxu1 %v2126_v21  ;;  %v3334_v21 = vand.u32 4294901760, %v2266_v37 }
  0xcb   :  { %626 = vmatpush.msrb.mxu0 %v2174_v50  ;;  %575 = vmatpush.msra.mxu3 %v388_v13 }
  0xcc   :  { %689 = vmatpush.msrb.mxu1 %v2129_v22  ;;  %v3335_v22 = vand.u32 4294901760, %v2278_v44 }
  0xcd   :  { %628 = vmatpush.msrb.mxu0 %v2176_v51  ;;  %579 = vmatpush.msra.mxu3 %v3332_v19 }
  0xce   :  { %690 = vmatpush.msrb.mxu1 %v2132_v23  ;;  %v3336_v23 = vand.u32 4294901760, %v2290_v53 }
  0xcf   :  { %630 = vmatpush.msrb.mxu0 %v2178_v52  ;;  %583 = vmatpush.msra.mxu3 %v3333_v20 }
  0xd0   :  { %691 = vmatpush.msrb.mxu1 %v2135_v24 }
  0xd1   :  { %632 = vmatpush.msrb.mxu0 %v2180_v57  ;;  %587 = vmatpush.msra.mxu3 %v3334_v21 }
  0xd2   :  { %692 = vmatpush.msrb.mxu1 %v2138_v25  ;;  %v3337_v25 = vand.u32 4294901760, %v2305_v10 }
  0xd3   :  { %634 = vmatpush.msrb.mxu0 %v2182_v58  ;;  %591 = vmatpush.msra.mxu3 %v3335_v22 }
  0xd4   :  { %693 = vmatpush.msrb.mxu1 %v2141_v26  ;;  %v3338_v26 = vand.u32 4294901760, %v2313_v16 }
  0xd5   :  { %636 = vmatpush.msrb.mxu0 %v2184_v59  ;;  %595 = vmatpush.msra.mxu3 %v3336_v23 }
  0xd6   :  { %694 = vmatpush.msrb.mxu1 %v2144_v27  ;;  %v3339_v27 = vand.u32 4294901760, %v2322_v48  ;;  %v750_v48 = vld [vmem:[#allocation2 + $0xf0] sm:$0xff] }
  0xd7   :  { %638 = vmatpush.msrb.mxu0 %v2255_v15  ;;  %599 = vmatpush.msra.mxu3 %v3337_v25  ;;  %v2447_v46 = vand.u32 4294901760, %v750_v48 }
  0xd8   :  { %695 = vmatpush.msrb.mxu1 %v2152_v29  ;;  %v3340_v29 = vand.u32 4294901760, %v2337_v14 }
  0xd9   :  { %640 = vmatpush.msrb.mxu0 %v2260_v18  ;;  %603 = vmatpush.msra.mxu3 %v3338_v26  ;;  %v2463_v20 = vsub.f32 %v750_v48, %v2447_v46  ;;  %v744_v48 = vld [vmem:[#allocation2 + $0xc0] sm:$0xff] }
  0xda   :  { %696 = vmatpush.msrb.mxu1 %v2154_v30 }
  0xdb   :  { %642 = vmatpush.msrb.mxu0 %v2268_v38  ;;  %607 = vmatpush.msra.mxu3 %v3339_v27  ;;  %v802_v26 = vand.u32 4294901760, %v2463_v20 }
  0xdc   :  { %697 = vmatpush.msrb.mxu1 %v2157_v31 }
  0xdd   :  { %644 = vmatpush.msrb.mxu0 %v2280_v45  ;;  %611 = vmatpush.msra.mxu3 %v3340_v29 }
  0xde   :  { %698 = vmatpush.msrb.mxu1 %v2161_v33 }
  0xdf   :  { %646 = vmatpush.msrb.mxu0 %v2294_v54  ;;  %615 = vmatpush.msra.mxu3 %v448_v34 }
  0xe0   :  { %699 = vmatpush.msrb.mxu1 %v2164_v35 }
  0xe1   :  { %648 = vmatpush.msrb.mxu0 %v2301_v7  ;;  %619 = vmatpush.msra.mxu3 %v454_v47  ;;  %v2453_v47 = vand.u32 4294901760, %v747_v55 }
  0xe2   :  { %700 = vmatpush.msrb.mxu1 %v2167_v39  ;;  %v2434_v39 = vld [vmem:[%s3310_s3 + $0x4] sm:$0xf] }
  0xe3   :  { %650 = vmatpush.msrb.mxu0 %v2315_v32  ;;  %v299_v6 = vperm.slane %v2434_v39, 0  ;;  %v751_v32 = vld [vmem:[#allocation2 + $0xf8] sm:$0xff]  ;;  %v2473_v23 = vsub.f32 %v747_v55, %v2453_v47 }
  0xe4   :  { %701 = vmatpush.msrb.mxu1 %v2170_v42  ;;  %v2445_v14 = vand.u32 4294901760, %v751_v32 }
  0xe5   :  { %652 = vmatpush.msrb.mxu0 %v2324_v56  ;;  %v749_v56 = vld [vmem:[#allocation2 + $0xe8] sm:$0xff] }
  0xe6   :  { %v2449_v41 = vand.u32 4294901760, %v749_v56  ;;  %v2460_v19 = vsub.f32 %v751_v32, %v2445_v14  ;;  %754 = vmatpush.msrb.mxu2 %v2445_v14 }
  0xe7   :  { %654 = vmatpush.msrb.mxu0 %v2339_v4 }
  0xe8   :  { %v2466_v21 = vsub.f32 %v749_v56, %v2449_v41  ;;  %756 = vmatpush.msrb.mxu2 %v2447_v46 }
  0xe9   :  { %656 = vmatpush.msrb.mxu0 %v2352_v36 }
  0xea   :  { %v808_v27 = vand.u32 4294901760, %v2466_v21  ;;  %758 = vmatpush.msrb.mxu2 %v2449_v41 }
 0x13b   :  { %v272_v24 = vpop.f32.mrf.mxu2 }
 0x13c   :  { %v276_v50 = vrot.slane %v272_v24, 2 }
 0x13e   :  { %v278_v51 = vadd.f32 %v276_v50, %v272_v24  ;;  %v2476_v24 = vsub.f32 %v746_v12, %v2455_v49 }
 0x140   :  { %v279_v52 = vmul.f32 %v278_v51, %v278_v51  ;;  %v284_v63 = vperm.slane %v278_v51, 0 }
 0x142   :  { %v281_v57 = vrot.slane %v279_v52, 7  ;;  %v285_v2 = vsub.f32 %v2186_v60, %v284_v63  ;;  %v320_v60 = vperm.slane %v2150_v28, 1  ;;  %v748_v28 = vld [vmem:[#allocation2 + $0xe0] sm:$0xff] }
 0x143   :  { %v2451_v40 = vand.u32 4294901760, %v748_v28 }
 0x144   :  { %v283_v58 = vsub.f32 %v278_v51, %v281_v57  ;;  %v796_v51 = vand.u32 4294901760, %v2460_v19 }
 0x145   :  { %v2470_v22 = vsub.f32 %v748_v28, %v2451_v40  ;;  %760 = vmatpush.msrb.mxu2 %v2451_v40  ;;  %v743_v28 = vld [vmem:[#allocation2 + $0xb8] sm:$0xff] }
 0x146   :  { %v286_v30 = vadd.f32 1e-05, %v283_v58  ;;  %v797_v58 = vsub.f32 %v2460_v19, %v796_v51 }
 0x147   :  { %v814_v57 = vand.u32 4294901760, %v2470_v22  ;;  %762 = vmatpush.msrb.mxu2 %v2453_v47 }
 0x148   :  { %1990 = vrsqrt.f32 %v286_v30  ;;  %vm293_vm4 = vweird.f32 %v286_v30 }
 0x149   :  { %764 = vmatpush.msrb.mxu2 %v2455_v49 }
 0x14e   :  { %v1991_v31 = vpop.eup %1990 }
 0x14f   :  { %v288_v33 = vmul.f32 %v1991_v31, %v286_v30  ;;  %vm294_vm3 = vweird.f32 %v1991_v31  ;;  %v803_v30 = vsub.f32 %v2463_v20, %v802_v26 }
 0x150   :  { %vm295_vm5 = vmor %vm293_vm4, %vm294_vm3 }
 0x151   :  { %v289_v35 = vmul.f32 %v1991_v31, %v288_v33  ;;  %v804_v63 = vand.u32 4294901760, %v803_v30  ;;  %v741_v30 = vld [vmem:[#allocation2 + $0xa8] sm:$0xff] }
 0x153   :  { %v290_v59 = vmul.f32 0.5, %v289_v35 }
 0x155   :  { %v291_v62 = vsub.f32 1.5, %v290_v59  ;;  %v809_v59 = vsub.f32 %v2466_v21, %v808_v27 }
 0x157   :  { %v292_v0 = vmul.f32 %v1991_v31, %v291_v62  ;;  %v798_v62 = vand.u32 4294901760, %v797_v58 }
 0x159   :  { %v296_v42 = vsel %vm295_vm5, %v1991_v31, %v292_v0  ;;  %v820_v31 = vand.u32 4294901760, %v2473_v23  ;;  %v815_v0 = vsub.f32 %v2470_v22, %v814_v57 }
 0x15a   :  { %v297_v5 = vperm.slane %v296_v42, 1  ;;  %v826_v42 = vand.u32 4294901760, %v2476_v24 }
 0x15c   :  { %v298_v8 = vmul.f32 %v297_v5, %v285_v2 }
 0x15e   :  { %v300_v13 = vmul.f32 %v299_v6, %v298_v8  ;;  %v810_v6 = vand.u32 4294901760, %v809_v59  ;;  %v821_v8 = vsub.f32 %v2473_v23, %v820_v31 }
 0x160   :  { %v302_v34 = vadd.f32 %v301_v9, %v300_v13 }
 0x162   :  { %v303_v15 = vmax.f32 %v302_v34, 0.0  ;;  %v816_v34 = vand.u32 4294901760, %v815_v0  ;;  %v740_v0 = vld [vmem:[#allocation2 + $0xa0] sm:$0xff] }
 0x164   :  { %v353_v17 = vand.u32 4294901760, %v303_v15 }
 0x166   :  { %459 = vmatmul.f32.vlgmr.msra.gmra.mxu0 %v353_v17  ;;  %v354_v18 = vsub.f32 %v303_v15, %v353_v17  ;;  %v827_v15 = vsub.f32 %v2476_v24, %v826_v42 }
 0x167   :  { %897 = vmatpush.msra.mxu0 %v2460_v19  ;;  %v2650_v19 = vld [vmem:[#allocation2 + $0x1f8] sm:$0xff] }
 0x168   :  { %513 = vmatmul.f32.vlgmr.msra.gmra.mxu1 %v354_v18  ;;  %v355_v36 = vand.u32 4294901760, %v354_v18 }
 0x169   :  { %950 = vmatpush.msra.mxu1 %v2445_v14  ;;  %900 = vmatpush.msra.mxu0 %v2463_v20  ;;  %v2660_v20 = vld [vmem:[#allocation2 + $0x1e8] sm:$0xff] }
 0x16a   :  { %552 = vmatmul.f32.vlgmr.msra.gmra.mxu2 %v355_v36  ;;  %v356_v37 = vsub.f32 %v354_v18, %v355_v36  ;;  %v822_v36 = vand.u32 4294901760, %v821_v8  ;;  %v2572_v8 = vand.u32 4294901760, %v740_v0 }
 0x16b   :  { %952 = vmatpush.msra.mxu1 %v2447_v46  ;;  %903 = vmatpush.msra.mxu0 %v2466_v21  ;;  %v2666_v21 = vld [vmem:[#allocation2 + $0x1e0] sm:$0xff] }
 0x16c   :  { %v357_v38 = vand.u32 4294901760, %v356_v37 }
 0x16d   :  { %954 = vmatpush.msra.mxu1 %v2449_v41  ;;  %906 = vmatpush.msra.mxu0 %v2470_v22  ;;  %v2672_v22 = vld [vmem:[#allocation2 + $0x1d8] sm:$0xff] }
 0x16e   :  { %358 = vmatmul.f32.vlgmr.msrb.gmra.mxu3 %v357_v38  ;;  %658 = vmatmul.f32.vlgmr.msrb.gmra.mxu0 %v353_v17  ;;  %v828_v38 = vand.u32 4294901760, %v827_v15 }
 0x16f   :  { %956 = vmatpush.msra.mxu1 %v2451_v40  ;;  %799 = vmatpush.msrb.mxu3 %v798_v62 }
 0x170   :  { %909 = vmatpush.msra.mxu0 %v2473_v23  ;;  %v2696_v23 = vld [vmem:[#allocation2 + $0x1b8] sm:$0xff] }
 0x171   :  { %958 = vmatpush.msra.mxu1 %v2453_v47  ;;  %805 = vmatpush.msrb.mxu3 %v804_v63  ;;  %v2565_v63 = vand.u32 4294901760, %v741_v30 }
 0x172   :  { %912 = vmatpush.msra.mxu0 %v2476_v24 }
 0x173   :  { %960 = vmatpush.msra.mxu1 %v2455_v49  ;;  %811 = vmatpush.msrb.mxu3 %v810_v6 }
 0x175   :  { %817 = vmatpush.msrb.mxu3 %v816_v34 }
 0x176   :  { %621 = vmatmul.f32.vlgmr.msra.gmra.mxu3 %v353_v17 }
 0x177   :  { %823 = vmatpush.msrb.mxu3 %v822_v36 }
 0x179   :  { %829 = vmatpush.msrb.mxu3 %v828_v38 }
 0x1e3   :  { %v460_v43 = vpop.f32.mrf.mxu0 }
 0x1e5   :  { %v514_v54 = vpop.f32.mrf.mxu1 }
 0x1eb   :  { %v659_v3 = vpop.f32.mrf.mxu0 }
 0x1ed   :  { %v553_v7 = vpop.f32.mrf.mxu2 }
 0x1f1   :  { %v359_v44 = vpop.f32.mrf.mxu3 }
 0x1f2   :  { %v360_v45 = vadd.f32 %v359_v44, %v320_v60 }
 0x1f4   :  { %v461_v53 = vadd.f32 %v460_v43, %v360_v45 }
 0x1f6   :  { %v515_v4 = vadd.f32 %v514_v54, %v461_v53 }
 0x1f8   :  { %v554_v10 = vadd.f32 %v553_v7, %v515_v4 }
 0x1f9   :  { %v622_v16 = vpop.f32.mrf.mxu3 }
 0x1fa   :  { %v623_v11 = vadd.f32 %v622_v16, %v554_v10  ;;  %v745_v16 = vld [vmem:[#allocation2 + $0xc8] sm:$0xff] }
 0x1fb   :  { %v2526_v32 = vand.u32 4294901760, %v745_v16 }
 0x1fc   :  { %v2457_v61 = vadd.f32 %v659_v3, %v623_v11  ;;  %v2531_v11 = vand.u32 4294901760, %v744_v48  ;;  %v2539_v3 = vand.u32 4294901760, %v743_v28 }
 0x1fd   :  { %v2529_v56 = vsub.f32 %v745_v16, %v2526_v32  ;;  %766 = vmatpush.msrb.mxu2 %v2526_v32  ;;  %962 = vmatpush.msra.mxu1 %v2526_v32 }
 0x1fe   :  { %v662_v50 = vsel %vm229_vm1, %v2457_v61, 0.0  ;;  %v669_v25 = vmul.f32 %v2457_v61, %v2457_v61  ;;  %v2537_v12 = vsub.f32 %v744_v48, %v2531_v11  ;;  %v736_v48 = vld [vmem:[#allocation2 + $0x80] sm:$0xff] }
 0x1ff   :  { %v663_v52 = vrot.slane %v662_v50, 4  ;;  %v832_v55 = vand.u32 4294901760, %v2529_v56  ;;  %768 = vmatpush.msrb.mxu2 %v2531_v11  ;;  %915 = vmatpush.msra.mxu0 %v2529_v56 }
 0x200   :  { %v670_v29 = vsel %vm229_vm1, %v669_v25, 0.0  ;;  %964 = vmatpush.msra.mxu1 %v2531_v11 }
 0x201   :  { %v664_v33 = vadd.f32 %v663_v52, %v662_v50  ;;  %v671_v35 = vrot.slane %v670_v29, 4  ;;  %v742_v50 = vld [vmem:[#allocation2 + $0xb0] sm:$0xff]  ;;  %v833_v25 = vsub.f32 %v2529_v56, %v832_v55  ;;  %v838_v52 = vand.u32 4294901760, %v2537_v12  ;;  %770 = vmatpush.msrb.mxu2 %v2539_v3  ;;  %918 = vmatpush.msra.mxu0 %v2537_v12 }
 0x202   :  { %v2551_v58 = vand.u32 4294901760, %v742_v50  ;;  %966 = vmatpush.msra.mxu1 %v2539_v3  ;;  %v2726_v56 = vld [vmem:[#allocation2 + $0x190] sm:$0xff] }
 0x203   :  { %v665_v2 = vrot.slane %v664_v33, 2  ;;  %v672_v5 = vadd.f32 %v671_v35, %v670_v29  ;;  %v2549_v29 = vsub.f32 %v743_v28, %v2539_v3  ;;  %v839_v35 = vsub.f32 %v2537_v12, %v838_v52  ;;  %v2736_v12 = vld [vmem:[#allocation2 + $0x180] sm:$0xff] }
 0x204   :  { %v2561_v62 = vsub.f32 %v742_v50, %v2551_v58  ;;  %772 = vmatpush.msrb.mxu2 %v2551_v58  ;;  %968 = vmatpush.msra.mxu1 %v2551_v58 }
 0x205   :  { %v666_v9 = vadd.f32 %v665_v2, %v664_v33  ;;  %v673_v13 = vrot.slane %v672_v5, 2  ;;  %v834_v33 = vand.u32 4294901760, %v833_v25  ;;  %v844_v59 = vand.u32 4294901760, %v2549_v29  ;;  %921 = vmatpush.msra.mxu0 %v2549_v29 }
 0x206   :  { %v840_v2 = vand.u32 4294901760, %v839_v35  ;;  %v850_v6 = vand.u32 4294901760, %v2561_v62  ;;  %774 = vmatpush.msrb.mxu2 %v2565_v63  ;;  %970 = vmatpush.msra.mxu1 %v2565_v63 }
 0x207   :  { %v667_v17 = vrot.slane %v666_v9, 1  ;;  %v674_v18 = vadd.f32 %v673_v13, %v672_v5  ;;  %835 = vmatpush.msrb.mxu3 %v834_v33  ;;  %v845_v5 = vsub.f32 %v2549_v29, %v844_v59  ;;  %924 = vmatpush.msra.mxu0 %v2561_v62  ;;  %v739_v13 = vld [vmem:[#allocation2 + $0x98] sm:$0xff]  ;;  %v2623_v33 = vand.u32 4294901760, %v736_v48 }
 0x208   :  { %v851_v15 = vsub.f32 %v2561_v62, %v850_v6  ;;  %776 = vmatpush.msrb.mxu2 %v2572_v8  ;;  %972 = vmatpush.msra.mxu1 %v2572_v8 }
 0x209   :  { %v675_v37 = vrot.slane %v674_v18, 1  ;;  %v668_v60 = vadd.f32 %v667_v17, %v666_v9  ;;  %v2576_v9 = vsub.f32 %v741_v30, %v2565_v63  ;;  %841 = vmatpush.msrb.mxu3 %v840_v2  ;;  %v846_v34 = vand.u32 4294901760, %v845_v5 }
 0x20a   :  { %v2584_v17 = vsub.f32 %v740_v0, %v2572_v8  ;;  %v852_v38 = vand.u32 4294901760, %v851_v15  ;;  %v2633_v5 = vsub.f32 %v736_v48, %v2623_v33 }
 0x20b   :  { %v676_v43 = vadd.f32 %v675_v37, %v674_v18  ;;  %v2586_v18 = vand.u32 4294901760, %v739_v13  ;;  %v856_v36 = vand.u32 4294901760, %v2576_v9  ;;  %v738_v37 = vld [vmem:[#allocation2 + $0x90] sm:$0xff]  ;;  %927 = vmatpush.msra.mxu0 %v2576_v9  ;;  %847 = vmatpush.msrb.mxu3 %v846_v34 }
 0x20c   :  { %v886_v15 = vand.u32 4294901760, %v2633_v5 }
 0x20d   :  { %v677_v44 = vsel %vm245_vm2, %v668_v60, %v676_v43  ;;  %v862_v60 = vand.u32 4294901760, %v2584_v17  ;;  %v2593_v43 = vsub.f32 %v739_v13, %v2586_v18  ;;  %778 = vmatpush.msrb.mxu2 %v2586_v18  ;;  %930 = vmatpush.msra.mxu0 %v2584_v17 }
 0x20e   :  { %v678_v45 = vmul.f32 0.03125, %v677_v44  ;;  %v2595_v44 = vand.u32 4294901760, %v738_v37  ;;  %853 = vmatpush.msrb.mxu3 %v852_v38  ;;  %974 = vmatpush.msra.mxu1 %v2586_v18  ;;  %v887_v38 = vsub.f32 %v2633_v5, %v886_v15 }
 0x20f   :  { %933 = vmatpush.msra.mxu0 %v2593_v43 }
 0x210   :  { %v679_v53 = vpack.c.bf16 %v678_v45, %v678_v45  ;;  %780 = vmatpush.msrb.mxu2 %v2595_v44  ;;  %976 = vmatpush.msra.mxu1 %v2595_v44 }
 0x212   :  { %v680_v54 = vunpack.c.l.bf16 %v679_v53  ;;  %v737_v53 = vld [vmem:[#allocation2 + $0x88] sm:$0xff] }
 0x214   :  { %v681_v4 = vsub.f32 %v678_v45, %v680_v54  ;;  %v857_v45 = vsub.f32 %v2576_v9, %v856_v36 }
 0x216   :  { %v683_v7 = vrot.slane %v681_v4, 6  ;;  %v868_v4 = vand.u32 4294901760, %v2593_v43  ;;  %v858_v16 = vand.u32 4294901760, %v857_v45  ;;  %v2655_v45 = vld [vmem:[#allocation2 + $0x1f0] sm:$0xff] }
 0x218   :  { %v685_v10 = vsel %vm229_vm1, %v680_v54, %v683_v7  ;;  %v863_v54 = vsub.f32 %v2584_v17, %v862_v60  ;;  %v2608_v7 = vsub.f32 %v738_v37, %v2595_v44  ;;  %v869_v50 = vsub.f32 %v2593_v43, %v868_v4  ;;  %859 = vmatpush.msrb.mxu3 %v858_v16 }
 0x219   :  { %702 = vmatmul.f32.vlgmr.msrb.gmra.mxu1 %v685_v10  ;;  %v2610_v10 = vand.u32 4294901760, %v737_v53  ;;  %v730_v17 = vperm.slane %v2434_v39, 1  ;;  %v2748_v39 = vld [vmem:[%s3310_s3] sm:$0xf] }
 0x21a   :  { %v864_v28 = vand.u32 4294901760, %v863_v54  ;;  %v874_v25 = vand.u32 4294901760, %v2608_v7  ;;  %v870_v35 = vand.u32 4294901760, %v869_v50  ;;  %936 = vmatpush.msra.mxu0 %v2608_v7 }
 0x21b   :  { %v2620_v30 = vsub.f32 %v737_v53, %v2610_v10  ;;  %782 = vmatpush.msrb.mxu2 %v2610_v10  ;;  %978 = vmatpush.msra.mxu1 %v2610_v10 }
 0x21c   :  { %v875_v0 = vsub.f32 %v2608_v7, %v874_v25  ;;  %865 = vmatpush.msrb.mxu3 %v864_v28 }
 0x21d   :  { %v880_v2 = vand.u32 4294901760, %v2620_v30  ;;  %784 = vmatpush.msrb.mxu2 %v2623_v33  ;;  %939 = vmatpush.msra.mxu0 %v2620_v30 }
 0x21e   :  { %v876_v13 = vand.u32 4294901760, %v875_v0  ;;  %871 = vmatpush.msrb.mxu3 %v870_v35  ;;  %980 = vmatpush.msra.mxu1 %v2623_v33  ;;  %v1183_v0 = vld [vmem:[#allocation2 + $0x178] sm:$0xff] }
 0x21f   :  { %v881_v34 = vsub.f32 %v2620_v30, %v880_v2  ;;  %991 = vmatpush.msra.mxu2 %v796_v51  ;;  %942 = vmatpush.msra.mxu0 %v2633_v5  ;;  %v888_v51 = vand.u32 4294901760, %v887_v38  ;;  %v1181_v5 = vld [vmem:[#allocation2 + $0x168] sm:$0xff]  ;;  %v1180_v38 = vld [vmem:[#allocation2 + $0x160] sm:$0xff] }
 0x220   :  { %877 = vmatpush.msrb.mxu3 %v876_v13 }
 0x221   :  { %v882_v37 = vand.u32 4294901760, %v881_v34  ;;  %995 = vmatpush.msra.mxu2 %v802_v26  ;;  %1118 = vmatpush.msrb.mxu0 %v2650_v19  ;;  %v2751_v34 = vand.u32 4294901760, %v1183_v0 }
 0x223   :  { %999 = vmatpush.msra.mxu2 %v808_v27  ;;  %883 = vmatpush.msrb.mxu3 %v882_v37  ;;  %v2755_v37 = vand.u32 4294901760, %v1181_v5 }
 0x224   :  { %1119 = vmatpush.msrb.mxu0 %v2655_v45  ;;  %1186 = vmatpush.msrb.mxu1 %v2751_v34 }
 0x225   :  { %1003 = vmatpush.msra.mxu2 %v814_v57  ;;  %889 = vmatpush.msrb.mxu3 %v888_v51  ;;  %v2714_v57 = vld [vmem:[#allocation2 + $0x1a0] sm:$0xff]  ;;  %v1179_v51 = vld [vmem:[#allocation2 + $0x158] sm:$0xff] }
 0x226   :  { %1120 = vmatpush.msrb.mxu0 %v2660_v20 }
 0x227   :  { %1058 = vmatpush.msra.mxu3 %v2445_v14  ;;  %1007 = vmatpush.msra.mxu2 %v820_v31  ;;  %v2678_v14 = vld [vmem:[#allocation2 + $0x1d0] sm:$0xff] }
 0x228   :  { %1121 = vmatpush.msrb.mxu0 %v2666_v21 }
 0x229   :  { %1060 = vmatpush.msra.mxu3 %v2447_v46  ;;  %1011 = vmatpush.msra.mxu2 %v826_v42  ;;  %v2684_v46 = vld [vmem:[#allocation2 + $0x1c8] sm:$0xff]  ;;  %v2720_v42 = vld [vmem:[#allocation2 + $0x198] sm:$0xff] }
 0x22a   :  { %1122 = vmatpush.msrb.mxu0 %v2672_v22 }
 0x22b   :  { %1062 = vmatpush.msra.mxu3 %v2449_v41  ;;  %1015 = vmatpush.msra.mxu2 %v832_v55  ;;  %v2690_v41 = vld [vmem:[#allocation2 + $0x1c0] sm:$0xff]  ;;  %v2732_v55 = vld [vmem:[#allocation2 + $0x188] sm:$0xff] }
 0x22c   :  { %1123 = vmatpush.msrb.mxu0 %v2678_v14 }
 0x22d   :  { %1064 = vmatpush.msra.mxu3 %v2451_v40  ;;  %1019 = vmatpush.msra.mxu2 %v838_v52 }
 0x22e   :  { %1124 = vmatpush.msrb.mxu0 %v2684_v46 }
 0x22f   :  { %1066 = vmatpush.msra.mxu3 %v2453_v47  ;;  %1023 = vmatpush.msra.mxu2 %v844_v59  ;;  %v2702_v47 = vld [vmem:[#allocation2 + $0x1b0] sm:$0xff] }
 0x230   :  { %1125 = vmatpush.msrb.mxu0 %v2690_v41 }
 0x231   :  { %1068 = vmatpush.msra.mxu3 %v2455_v49  ;;  %1027 = vmatpush.msra.mxu2 %v850_v6  ;;  %v2708_v49 = vld [vmem:[#allocation2 + $0x1a8] sm:$0xff] }
 0x232   :  { %1126 = vmatpush.msrb.mxu0 %v2696_v23 }
 0x233   :  { %1070 = vmatpush.msra.mxu3 %v2526_v32  ;;  %1031 = vmatpush.msra.mxu2 %v856_v36  ;;  %v732_v36 = vperm.slane %v2439_v1, 1  ;;  %v752_v1 = vperm.slane %v2748_v39, 2 }
 0x234   :  { %1127 = vmatpush.msrb.mxu0 %v2702_v47 }
 0x235   :  { %1072 = vmatpush.msra.mxu3 %v2531_v11  ;;  %1035 = vmatpush.msra.mxu2 %v862_v60 }
 0x236   :  { %1128 = vmatpush.msrb.mxu0 %v2708_v49 }
 0x237   :  { %1074 = vmatpush.msra.mxu3 %v2539_v3  ;;  %1039 = vmatpush.msra.mxu2 %v868_v4 }
 0x238   :  { %1129 = vmatpush.msrb.mxu0 %v2714_v57 }
 0x239   :  { %1076 = vmatpush.msra.mxu3 %v2551_v58  ;;  %1043 = vmatpush.msra.mxu2 %v874_v25 }
 0x23a   :  { %1130 = vmatpush.msrb.mxu0 %v2720_v42 }
 0x23b   :  { %1078 = vmatpush.msra.mxu3 %v2565_v63  ;;  %1047 = vmatpush.msra.mxu2 %v880_v2  ;;  %v1182_v2 = vld [vmem:[#allocation2 + $0x170] sm:$0xff] }
 0x23c   :  { %1131 = vmatpush.msrb.mxu0 %v2726_v56 }
 0x23d   :  { %1080 = vmatpush.msra.mxu3 %v2572_v8  ;;  %1051 = vmatpush.msra.mxu2 %v886_v15  ;;  %v2753_v15 = vand.u32 4294901760, %v1182_v2 }
 0x23e   :  { %1132 = vmatpush.msrb.mxu0 %v2732_v55 }
 0x23f   :  { %1082 = vmatpush.msra.mxu3 %v2586_v18  ;;  %1188 = vmatpush.msrb.mxu1 %v2753_v15 }
 0x240   :  { %1133 = vmatpush.msrb.mxu0 %v2736_v12 }
 0x241   :  { %1084 = vmatpush.msra.mxu3 %v2595_v44  ;;  %1190 = vmatpush.msrb.mxu1 %v2755_v37 }
 0x243   :  { %1086 = vmatpush.msra.mxu3 %v2610_v10 }
 0x245   :  { %1088 = vmatpush.msra.mxu3 %v2623_v33 }
 0x296   :  { %v703_v40 = vpop.f32.mrf.mxu1 }
 0x297   :  { %v707_v24 = vrot.slane %v703_v40, 2 }
 0x299   :  { %v709_v26 = vadd.f32 %v707_v24, %v703_v40  ;;  %v1178_v40 = vld [vmem:[#allocation2 + $0x150] sm:$0xff] }
 0x29b   :  { %v710_v27 = vmul.f32 %v709_v26, %v709_v26  ;;  %v715_v62 = vperm.slane %v709_v26, 0 }
 0x29d   :  { %v712_v31 = vrot.slane %v710_v27, 7  ;;  %v716_v8 = vsub.f32 %v2457_v61, %v715_v62  ;;  %v2759_v27 = vand.u32 4294901760, %v1179_v51 }
 0x29f   :  { %v714_v32 = vsub.f32 %v709_v26, %v712_v31  ;;  %v2757_v26 = vand.u32 4294901760, %v1180_v38  ;;  %v2761_v31 = vand.u32 4294901760, %v1178_v40 }
 0x2a1   :  { %v717_v11 = vadd.f32 1e-05, %v714_v32  ;;  %1192 = vmatpush.msrb.mxu1 %v2757_v26 }
 0x2a3   :  { %1992 = vrsqrt.f32 %v717_v11  ;;  %vm724_vm7 = vweird.f32 %v717_v11  ;;  %1194 = vmatpush.msrb.mxu1 %v2759_v27 }
 0x2a5   :  { %1196 = vmatpush.msrb.mxu1 %v2761_v31 }
 0x2a9   :  { %v1993_v3 = vpop.eup %1992 }
 0x2aa   :  { %v719_v52 = vmul.f32 %v1993_v3, %v717_v11  ;;  %vm725_vm6 = vweird.f32 %v1993_v3  ;;  %v2766_v11 = vsub.f32 %v1183_v0, %v2751_v34 }
 0x2ab   :  { %vm726_vm8 = vmor %vm724_vm7, %vm725_vm6 }
 0x2ac   :  { %v720_v29 = vmul.f32 %v1993_v3, %v719_v52  ;;  %v2772_v52 = vsub.f32 %v1181_v5, %v2755_v37 }
 0x2ae   :  { %v721_v58 = vmul.f32 0.5, %v720_v29  ;;  %v2776_v29 = vsub.f32 %v1180_v38, %v2757_v26 }
 0x2b0   :  { %v722_v59 = vsub.f32 1.5, %v721_v58  ;;  %v2779_v58 = vsub.f32 %v1179_v51, %v2759_v27 }
 0x2b2   :  { %v723_v63 = vmul.f32 %v1993_v3, %v722_v59  ;;  %v2782_v59 = vsub.f32 %v1178_v40, %v2761_v31 }
 0x2b4   :  { %v727_v6 = vsel %vm726_vm8, %v1993_v3, %v723_v63  ;;  %v2769_v3 = vsub.f32 %v1182_v2, %v2753_v15 }
 0x2b5   :  { %v728_v9 = vperm.slane %v727_v6, 1  ;;  %v1228_v6 = vand.u32 4294901760, %v2766_v11 }
 0x2b7   :  { %v729_v18 = vmul.f32 %v728_v9, %v716_v8  ;;  %v1234_v8 = vand.u32 4294901760, %v2769_v3 }
 0x2b9   :  { %v731_v60 = vmul.f32 %v730_v17, %v729_v18  ;;  %v1240_v17 = vand.u32 4294901760, %v2772_v52  ;;  %v1246_v18 = vand.u32 4294901760, %v2776_v29 }
 0x2bb   :  { %v733_v43 = vadd.f32 %v732_v36, %v731_v60  ;;  %v1229_v60 = vsub.f32 %v2766_v11, %v1228_v6 }
 0x2bd   :  { %v734_v44 = vmax.f32 %v733_v43, 0.0  ;;  %v1235_v43 = vsub.f32 %v2769_v3, %v1234_v8 }
 0x2bf   :  { %v785_v53 = vand.u32 4294901760, %v734_v44 }
 0x2c1   :  { %891 = vmatmul.f32.vlgmr.msrb.gmra.mxu3 %v785_v53  ;;  %v786_v54 = vsub.f32 %v734_v44, %v785_v53  ;;  %v1252_v44 = vand.u32 4294901760, %v2779_v58 }
 0x2c2   :  { %1329 = vmatpush.msrb.mxu3 %v2766_v11 }
 0x2c3   :  { %945 = vmatmul.f32.vlgmr.msra.gmra.mxu0 %v786_v54  ;;  %v787_v4 = vand.u32 4294901760, %v786_v54 }
 0x2c4   :  { %1382 = vmatpush.msra.mxu0 %v2751_v34  ;;  %1332 = vmatpush.msrb.mxu3 %v2769_v3 }
 0x2c5   :  { %984 = vmatmul.f32.vlgmr.msra.gmra.mxu1 %v787_v4  ;;  %v788_v7 = vsub.f32 %v786_v54, %v787_v4  ;;  %v1241_v4 = vsub.f32 %v2772_v52, %v1240_v17 }
 0x2c6   :  { %1384 = vmatpush.msra.mxu0 %v2753_v15  ;;  %1335 = vmatpush.msrb.mxu3 %v2772_v52 }
 0x2c7   :  { %v789_v10 = vand.u32 4294901760, %v788_v7  ;;  %v1230_v7 = vand.u32 4294901760, %v1229_v60 }
 0x2c8   :  { %1386 = vmatpush.msra.mxu0 %v2755_v37  ;;  %1338 = vmatpush.msrb.mxu3 %v2776_v29 }
 0x2c9   :  { %790 = vmatmul.f32.vlgmr.msrb.gmra.mxu2 %v789_v10  ;;  %1090 = vmatmul.f32.vlgmr.msra.gmra.mxu3 %v785_v53  ;;  %v1236_v10 = vand.u32 4294901760, %v1235_v43 }
 0x2ca   :  { %1388 = vmatpush.msra.mxu0 %v2757_v26  ;;  %1231 = vmatpush.msrb.mxu2 %v1230_v7 }
 0x2cb   :  { %1341 = vmatpush.msrb.mxu3 %v2779_v58 }
 0x2cc   :  { %1390 = vmatpush.msra.mxu0 %v2759_v27  ;;  %1237 = vmatpush.msrb.mxu2 %v1236_v10 }
 0x2cd   :  { %1344 = vmatpush.msrb.mxu3 %v2782_v59 }
 0x2ce   :  { %1392 = vmatpush.msra.mxu0 %v2761_v31 }
 0x2d1   :  { %1053 = vmatmul.f32.vlgmr.msra.gmra.mxu2 %v785_v53 }
 0x340   :  { %v946_v50 = vpop.f32.mrf.mxu0 }
 0x342   :  { %v985_v30 = vpop.f32.mrf.mxu1 }
 0x344   :  { %v892_v61 = vpop.f32.mrf.mxu3 }
 0x34c   :  { %v791_v16 = vpop.f32.mrf.mxu2  ;;  %v1091_v24 = vpop.f32.mrf.mxu3 }
 0x34d   :  { %v792_v48 = vadd.f32 %v791_v16, %v752_v1  ;;  %v1247_v1 = vsub.f32 %v2776_v29, %v1246_v18 }
 0x34f   :  { %v893_v28 = vadd.f32 %v892_v61, %v792_v48  ;;  %v3329_v61 = vand.u32 4294901760, %v2782_v59 }
 0x351   :  { %v947_v25 = vadd.f32 %v946_v50, %v893_v28  ;;  %v1242_v28 = vand.u32 4294901760, %v1241_v4  ;;  %v1253_v50 = vsub.f32 %v2779_v58, %v1252_v44  ;;  %v1176_v4 = vld [vmem:[#allocation2 + $0x140] sm:$0xff] }
 0x352   :  { %v2837_v10 = vand.u32 4294901760, %v1176_v4 }
 0x353   :  { %v986_v33 = vadd.f32 %v985_v30, %v947_v25  ;;  %1243 = vmatpush.msrb.mxu2 %v1242_v28  ;;  %v1254_v5 = vand.u32 4294901760, %v1253_v50  ;;  %v1174_v50 = vld [vmem:[#allocation2 + $0x130] sm:$0xff] }
 0x354   :  { %v1054_v35 = vpop.f32.mrf.mxu2 }
 0x355   :  { %v1055_v13 = vadd.f32 %v1054_v35, %v986_v33  ;;  %v1248_v33 = vand.u32 4294901760, %v1247_v1  ;;  %v1259_v35 = vsub.f32 %v2782_v59, %v3329_v61  ;;  %v1175_v1 = vld [vmem:[#allocation2 + $0x138] sm:$0xff] }
 0x356   :  { %v2845_v28 = vand.u32 4294901760, %v1175_v1 }
 0x357   :  { %v2763_v32 = vadd.f32 %v1091_v24, %v1055_v13  ;;  %1249 = vmatpush.msrb.mxu2 %v1248_v33  ;;  %v1260_v38 = vand.u32 4294901760, %v1259_v35  ;;  %v2857_v35 = vand.u32 4294901760, %v1174_v50 }
 0x358   :  { %v2855_v33 = vsub.f32 %v1175_v1, %v2845_v28 }
 0x359   :  { %v1094_v62 = vsel %vm229_vm1, %v2763_v32, 0.0  ;;  %v1101_v63 = vmul.f32 %v2763_v32, %v2763_v32  ;;  %1255 = vmatpush.msrb.mxu2 %v1254_v5 }
 0x35a   :  { %v1095_v9 = vrot.slane %v1094_v62, 4 }
 0x35b   :  { %v1102_v36 = vsel %vm229_vm1, %v1101_v63, 0.0  ;;  %1261 = vmatpush.msrb.mxu2 %v1260_v38  ;;  %v2867_v38 = vsub.f32 %v1174_v50, %v2857_v35 }
 0x35c   :  { %v1096_v53 = vadd.f32 %v1095_v9, %v1094_v62  ;;  %v1103_v54 = vrot.slane %v1102_v36, 4 }
 0x35e   :  { %v1097_v16 = vrot.slane %v1096_v53, 2  ;;  %v1104_v48 = vadd.f32 %v1103_v54, %v1102_v36 }
 0x360   :  { %v1098_v25 = vadd.f32 %v1097_v16, %v1096_v53  ;;  %v1105_v30 = vrot.slane %v1104_v48, 2  ;;  %v1177_v53 = vld [vmem:[#allocation2 + $0x148] sm:$0xff] }
 0x361   :  { %v2832_v54 = vand.u32 4294901760, %v1177_v53 }
 0x362   :  { %v1099_v0 = vrot.slane %v1098_v25, 1  ;;  %v1106_v2 = vadd.f32 %v1105_v30, %v1104_v48  ;;  %v2843_v48 = vsub.f32 %v1176_v4, %v2837_v10 }
 0x363   :  { %v2835_v7 = vsub.f32 %v1177_v53, %v2832_v54  ;;  %1198 = vmatpush.msrb.mxu1 %v2832_v54  ;;  %1394 = vmatpush.msra.mxu0 %v2832_v54 }
 0x364   :  { %v1107_v13 = vrot.slane %v1106_v2, 1  ;;  %v1100_v51 = vadd.f32 %v1099_v0, %v1098_v25  ;;  %v3327_v30 = vand.u32 4294901760, %v2843_v48  ;;  %v1173_v0 = vld [vmem:[#allocation2 + $0x128] sm:$0xff] }
 0x365   :  { %v3328_v16 = vand.u32 4294901760, %v2835_v7  ;;  %1200 = vmatpush.msrb.mxu1 %v2837_v10  ;;  %1347 = vmatpush.msrb.mxu3 %v2835_v7 }
 0x366   :  { %v1108_v40 = vadd.f32 %v1107_v13, %v1106_v2  ;;  %1396 = vmatpush.msra.mxu0 %v2837_v10  ;;  %v1271_v5 = vsub.f32 %v2843_v48, %v3327_v30  ;;  %v3325_v13 = vand.u32 4294901760, %v2855_v33 }
 0x367   :  { %v1265_v25 = vsub.f32 %v2835_v7, %v3328_v16  ;;  %1202 = vmatpush.msrb.mxu1 %v2845_v28  ;;  %1350 = vmatpush.msrb.mxu3 %v2843_v48 }
 0x368   :  { %v1109_v24 = vsel %vm245_vm2, %v1100_v51, %v1108_v40  ;;  %1398 = vmatpush.msra.mxu0 %v2845_v28  ;;  %v2871_v51 = vand.u32 4294901760, %v1173_v0  ;;  %v1172_v40 = vld [vmem:[#allocation2 + $0x120] sm:$0xff] }
 0x369   :  { %v1110_v62 = vmul.f32 0.03125, %v1109_v24  ;;  %v1266_v2 = vand.u32 4294901760, %v1265_v25  ;;  %1204 = vmatpush.msrb.mxu1 %v2857_v35  ;;  %1353 = vmatpush.msrb.mxu3 %v2855_v33  ;;  %v1272_v24 = vand.u32 4294901760, %v1271_v5  ;;  %v1170_v25 = vld [vmem:[#allocation2 + $0x110] sm:$0xff] }
 0x36a   :  { %1400 = vmatpush.msra.mxu0 %v2857_v35 }
 0x36b   :  { %v1111_v63 = vpack.c.bf16 %v1110_v62, %v1110_v62  ;;  %1267 = vmatpush.msrb.mxu2 %v1266_v2  ;;  %1356 = vmatpush.msrb.mxu3 %v2867_v38 }
 0x36c   :  { %1206 = vmatpush.msrb.mxu1 %v2871_v51  ;;  %1402 = vmatpush.msra.mxu0 %v2871_v51 }
 0x36d   :  { %v1112_v9 = vunpack.c.l.bf16 %v1111_v63  ;;  %v3323_v63 = vand.u32 4294901760, %v2867_v38  ;;  %1273 = vmatpush.msrb.mxu2 %v1272_v24  ;;  %v2901_v24 = vand.u32 4294901760, %v1170_v25 }
 0x36f   :  { %v1113_v36 = vsub.f32 %v1110_v62, %v1112_v9  ;;  %v1277_v62 = vsub.f32 %v2855_v33, %v3325_v13  ;;  %v1283_v53 = vsub.f32 %v2867_v38, %v3323_v63  ;;  %v1168_v13 = vld [vmem:[#allocation2 + $0x100] sm:$0xff] }
 0x370   :  { %v2929_v16 = vand.u32 4294901760, %v1168_v13 }
 0x371   :  { %v1115_v60 = vrot.slane %v1113_v36, 6  ;;  %v2882_v36 = vsub.f32 %v1173_v0, %v2871_v51  ;;  %v1284_v0 = vand.u32 4294901760, %v1283_v53  ;;  %v2914_v53 = vsub.f32 %v1170_v25, %v2901_v24 }
 0x373   :  { %v1117_v43 = vsel %vm229_vm1, %v1112_v9, %v1115_v60  ;;  %v2878_v9 = vand.u32 4294901760, %v1172_v40  ;;  %v1171_v60 = vld [vmem:[#allocation2 + $0x118] sm:$0xff]  ;;  %v3324_v50 = vand.u32 4294901760, %v2882_v36  ;;  %1359 = vmatpush.msrb.mxu3 %v2882_v36  ;;  %v3331_v30 = vand.u32 4294901760, %v2914_v53 }
 0x374   :  { %1134 = vmatmul.f32.vlgmr.msrb.gmra.mxu0 %v1117_v43  ;;  %v1278_v43 = vand.u32 4294901760, %v1277_v62  ;;  %v2892_v1 = vand.u32 4294901760, %v1171_v60  ;;  %v1169_v62 = vld [vmem:[#allocation2 + $0x108] sm:$0xff] }
 0x375   :  { %v2890_v4 = vsub.f32 %v1172_v40, %v2878_v9  ;;  %1208 = vmatpush.msrb.mxu1 %v2878_v9  ;;  %1404 = vmatpush.msra.mxu0 %v2878_v9  ;;  %v1289_v40 = vsub.f32 %v2882_v36, %v3324_v50  ;;  %v2916_v63 = vand.u32 4294901760, %v1169_v62 }
 0x376   :  { %1279 = vmatpush.msrb.mxu2 %v1278_v43  ;;  %v2899_v5 = vsub.f32 %v1171_v60, %v2892_v1 }
 0x377   :  { %v3326_v2 = vand.u32 4294901760, %v2890_v4  ;;  %1210 = vmatpush.msrb.mxu1 %v2892_v1  ;;  %1362 = vmatpush.msrb.mxu3 %v2890_v4  ;;  %v1290_v50 = vand.u32 4294901760, %v1289_v40  ;;  %v2926_v25 = vsub.f32 %v1169_v62, %v2916_v63  ;;  %v2939_v62 = vsub.f32 %v1168_v13, %v2929_v16 }
 0x378   :  { %1285 = vmatpush.msrb.mxu2 %v1284_v0  ;;  %v3330_v60 = vand.u32 4294901760, %v2899_v5  ;;  %1406 = vmatpush.msra.mxu0 %v2892_v1 }
 0x379   :  { %v1295_v43 = vsub.f32 %v2890_v4, %v3326_v2  ;;  %1212 = vmatpush.msrb.mxu1 %v2901_v24  ;;  %1365 = vmatpush.msrb.mxu3 %v2899_v5  ;;  %v1312_v61 = vand.u32 4294901760, %v2926_v25 }
 0x37a   :  { %v1301_v2 = vsub.f32 %v2899_v5, %v3330_v60  ;;  %1408 = vmatpush.msra.mxu0 %v2901_v24  ;;  %1291 = vmatpush.msrb.mxu2 %v1290_v50 }
 0x37b   :  { %v1296_v0 = vand.u32 4294901760, %v1295_v43  ;;  %1214 = vmatpush.msrb.mxu1 %v2916_v63  ;;  %v1307_v43 = vsub.f32 %v2914_v53, %v3331_v30  ;;  %1368 = vmatpush.msrb.mxu3 %v2914_v53  ;;  %v1313_v60 = vsub.f32 %v2926_v25, %v1312_v61 }
 0x37c   :  { %v1302_v40 = vand.u32 4294901760, %v1301_v2  ;;  %1410 = vmatpush.msra.mxu0 %v2916_v63  ;;  %v1318_v2 = vand.u32 4294901760, %v2939_v62 }
 0x37d   :  { %1297 = vmatpush.msrb.mxu2 %v1296_v0  ;;  %1216 = vmatpush.msrb.mxu1 %v2929_v16  ;;  %v1308_v50 = vand.u32 4294901760, %v1307_v43  ;;  %v1314_v30 = vand.u32 4294901760, %v1313_v60 }
 0x37e   :  { %1371 = vmatpush.msrb.mxu3 %v2926_v25  ;;  %1412 = vmatpush.msra.mxu0 %v2929_v16  ;;  %v1319_v13 = vsub.f32 %v2939_v62, %v1318_v2 }
 0x37f   :  { %1423 = vmatpush.msra.mxu1 %v1228_v6  ;;  %1303 = vmatpush.msrb.mxu2 %v1302_v40 }
 0x380   :  { %1374 = vmatpush.msrb.mxu3 %v2939_v62  ;;  %v1320_v11 = vand.u32 4294901760, %v1319_v13 }
 0x381   :  { %1427 = vmatpush.msra.mxu1 %v1234_v8  ;;  %1309 = vmatpush.msrb.mxu2 %v1308_v50 }
 0x382   :  { %1550 = vmatpush.msra.mxu3 %v2650_v19  ;;  %v3341_v19 = vand.u32 4294901760, %v2782_v59  ;;  %v3012_v59 = vld [vmem:[%s3310_s3 + $0x4] sm:$0xf] }
 0x383   :  { %1431 = vmatpush.msra.mxu1 %v1240_v17  ;;  %1315 = vmatpush.msrb.mxu2 %v1314_v30  ;;  %v1162_v6 = vperm.slane %v3012_v59, 2  ;;  %v3018_v17 = vld [vmem:[%s3310_s3 + $0x8] sm:$0xf] }
 0x384   :  { %1551 = vmatpush.msra.mxu3 %v2655_v45  ;;  %v3342_v45 = vand.u32 4294901760, %v2835_v7 }
 0x385   :  { %1435 = vmatpush.msra.mxu1 %v1246_v18  ;;  %1321 = vmatpush.msrb.mxu2 %v1320_v11  ;;  %v1164_v18 = vperm.slane %v3018_v17, 2 }
 0x386   :  { %1552 = vmatpush.msra.mxu3 %v2660_v20  ;;  %v3343_v20 = vand.u32 4294901760, %v2843_v48 }
 0x387   :  { %1490 = vmatpush.msra.mxu2 %v2751_v34  ;;  %1439 = vmatpush.msra.mxu1 %v1252_v44 }
 0x388   :  { %1553 = vmatpush.msra.mxu3 %v2666_v21  ;;  %v3344_v21 = vand.u32 4294901760, %v2855_v33 }
 0x389   :  { %1492 = vmatpush.msra.mxu2 %v2753_v15  ;;  %1443 = vmatpush.msra.mxu1 %v3341_v19 }
 0x38a   :  { %1554 = vmatpush.msra.mxu3 %v2672_v22  ;;  %v3345_v22 = vand.u32 4294901760, %v2867_v38 }
 0x38b   :  { %1494 = vmatpush.msra.mxu2 %v2755_v37  ;;  %1447 = vmatpush.msra.mxu1 %v3342_v45 }
 0x38c   :  { %1555 = vmatpush.msra.mxu3 %v2678_v14 }
 0x38d   :  { %1496 = vmatpush.msra.mxu2 %v2757_v26  ;;  %1451 = vmatpush.msra.mxu1 %v3343_v20 }
 0x38e   :  { %1556 = vmatpush.msra.mxu3 %v2684_v46  ;;  %v3346_v46 = vand.u32 4294901760, %v2882_v36 }
 0x38f   :  { %1498 = vmatpush.msra.mxu2 %v2759_v27  ;;  %1455 = vmatpush.msra.mxu1 %v3344_v21 }
 0x390   :  { %1557 = vmatpush.msra.mxu3 %v2690_v41  ;;  %v3347_v41 = vand.u32 4294901760, %v2890_v4 }
 0x391   :  { %1500 = vmatpush.msra.mxu2 %v2761_v31  ;;  %1459 = vmatpush.msra.mxu1 %v3345_v22 }
 0x392   :  { %1558 = vmatpush.msra.mxu3 %v2696_v23  ;;  %v3348_v23 = vand.u32 4294901760, %v2899_v5 }
 0x393   :  { %1502 = vmatpush.msra.mxu2 %v2832_v54  ;;  %1463 = vmatpush.msra.mxu1 %v3346_v46 }
 0x394   :  { %1559 = vmatpush.msra.mxu3 %v2702_v47  ;;  %v3349_v47 = vand.u32 4294901760, %v2914_v53 }
 0x395   :  { %1504 = vmatpush.msra.mxu2 %v2837_v10  ;;  %1467 = vmatpush.msra.mxu1 %v3347_v41 }
 0x396   :  { %1560 = vmatpush.msra.mxu3 %v2708_v49 }
 0x397   :  { %1506 = vmatpush.msra.mxu2 %v2845_v28  ;;  %1471 = vmatpush.msra.mxu1 %v3348_v23  ;;  %v1184_v28 = vperm.slane %v2748_v39, 3 }
 0x398   :  { %1561 = vmatpush.msra.mxu3 %v2714_v57 }
 0x399   :  { %1508 = vmatpush.msra.mxu2 %v2857_v35  ;;  %1475 = vmatpush.msra.mxu1 %v3349_v47 }
 0x39a   :  { %1562 = vmatpush.msra.mxu3 %v2720_v42 }
 0x39b   :  { %1510 = vmatpush.msra.mxu2 %v2871_v51  ;;  %1479 = vmatpush.msra.mxu1 %v1312_v61 }
 0x39c   :  { %1563 = vmatpush.msra.mxu3 %v2726_v56 }
 0x39d   :  { %1512 = vmatpush.msra.mxu2 %v2878_v9  ;;  %1483 = vmatpush.msra.mxu1 %v1318_v2 }
 0x39e   :  { %1564 = vmatpush.msra.mxu3 %v2732_v55 }
 0x39f   :  { %1514 = vmatpush.msra.mxu2 %v2892_v1 }
 0x3a0   :  { %1565 = vmatpush.msra.mxu3 %v2736_v12 }
 0x3a1   :  { %1516 = vmatpush.msra.mxu2 %v2901_v24 }
 0x3a3   :  { %1518 = vmatpush.msra.mxu2 %v2916_v63 }
 0x3a5   :  { %1520 = vmatpush.msra.mxu2 %v2929_v16 }
 0x3f1   :  { %v1135_v14 = vpop.f32.mrf.mxu0 }
 0x3f2   :  { %v1139_v34 = vrot.slane %v1135_v14, 2 }
 0x3f4   :  { %v1141_v15 = vadd.f32 %v1139_v34, %v1135_v14 }
 0x3f6   :  { %v1142_v37 = vmul.f32 %v1141_v15, %v1141_v15  ;;  %v1147_v52 = vperm.slane %v1141_v15, 0 }
 0x3f8   :  { %v1144_v26 = vrot.slane %v1142_v37, 7  ;;  %v1148_v58 = vsub.f32 %v2763_v32, %v1147_v52  ;;  %v1622_v37 = vld [vmem:[%s3311_s4 + $0x78] sm:$0xff] }
 0x3f9   :  { %v3034_v23 = vand.u32 4294901760, %v1622_v37 }
 0x3fa   :  { %v1146_v27 = vsub.f32 %v1141_v15, %v1144_v26  ;;  %v1621_v26 = vld [vmem:[%s3311_s4 + $0x70] sm:$0xff] }
 0x3fb   :  { %v3040_v47 = vsub.f32 %v1622_v37, %v3034_v23  ;;  %1625 = vmatpush.msrb.mxu0 %v3034_v23 }
 0x3fc   :  { %v1149_v49 = vadd.f32 1e-05, %v1146_v27  ;;  %v3042_v27 = vand.u32 4294901760, %v1621_v26 }
 0x3fe   :  { %1994 = vrsqrt.f32 %v1149_v49  ;;  %vm1156_vm10 = vweird.f32 %v1149_v49  ;;  %1627 = vmatpush.msrb.mxu0 %v3042_v27 }
 0x404   :  { %v1995_v57 = vpop.eup %1994 }
 0x405   :  { %v1151_v42 = vmul.f32 %v1995_v57, %v1149_v49  ;;  %vm1157_vm9 = vweird.f32 %v1995_v57  ;;  %v1620_v49 = vld [vmem:[%s3311_s4 + $0x68] sm:$0xff] }
 0x406   :  { %vm1158_vm11 = vmor %vm1156_vm10, %vm1157_vm9 }
 0x407   :  { %v1152_v56 = vmul.f32 %v1995_v57, %v1151_v42  ;;  %v3051_v42 = vsub.f32 %v1621_v26, %v3042_v27  ;;  %v1610_v26 = vld [vmem:[%s3311_s4 + $0x18] sm:$0xff] }
 0x409   :  { %v1153_v31 = vmul.f32 0.5, %v1152_v56  ;;  %v3053_v56 = vand.u32 4294901760, %v1620_v49  ;;  %v1673_v52 = vand.u32 4294901760, %v3051_v42 }
 0x40b   :  { %v1154_v3 = vsub.f32 1.5, %v1153_v31  ;;  %v1619_v31 = vld [vmem:[%s3311_s4 + $0x60] sm:$0xff]  ;;  %1629 = vmatpush.msrb.mxu0 %v3053_v56 }
 0x40d   :  { %v1155_v29 = vmul.f32 %v1995_v57, %v1154_v3 }
 0x40f   :  { %v1159_v55 = vsel %vm1158_vm11, %v1995_v57, %v1155_v29  ;;  %v1667_v57 = vand.u32 4294901760, %v3040_v47  ;;  %v3066_v29 = vsub.f32 %v1620_v49, %v3053_v56 }
 0x410   :  { %v1160_v12 = vperm.slane %v1159_v55, 1  ;;  %v3068_v55 = vand.u32 4294901760, %v1619_v31 }
 0x411   :  { %v1668_v3 = vsub.f32 %v3040_v47, %v1667_v57 }
 0x412   :  { %v1161_v8 = vmul.f32 %v1160_v12, %v1148_v58  ;;  %v1618_v58 = vld [vmem:[%s3311_s4 + $0x58] sm:$0xff]  ;;  %1631 = vmatpush.msrb.mxu0 %v3068_v55 }
 0x413   :  { %v1669_v12 = vand.u32 4294901760, %v1668_v3 }
 0x414   :  { %v1163_v44 = vmul.f32 %v1162_v6, %v1161_v8  ;;  %v1674_v6 = vsub.f32 %v3051_v42, %v1673_v52  ;;  %v1679_v8 = vand.u32 4294901760, %v3066_v29 }
 0x416   :  { %v1165_v61 = vadd.f32 %v1164_v18, %v1163_v44  ;;  %v3081_v18 = vsub.f32 %v1619_v31, %v3068_v55  ;;  %v3085_v44 = vand.u32 4294901760, %v1618_v58 }
 0x418   :  { %v1166_v54 = vmax.f32 %v1165_v61, 0.0  ;;  %v1617_v61 = vld [vmem:[%s3311_s4 + $0x50] sm:$0xff]  ;;  %1633 = vmatpush.msrb.mxu0 %v3085_v44 }
 0x41a   :  { %v1217_v32 = vand.u32 4294901760, %v1166_v54 }
 0x41c   :  { %1323 = vmatmul.f32.vlgmr.msrb.gmra.mxu2 %v1217_v32  ;;  %v1218_v7 = vsub.f32 %v1166_v54, %v1217_v32  ;;  %v1675_v54 = vand.u32 4294901760, %v1674_v6  ;;  %v1609_v6 = vld [vmem:[%s3311_s4 + $0x10] sm:$0xff] }
 0x41d   :  { %1768 = vmatpush.msrb.mxu2 %v3040_v47 }
 0x41e   :  { %1377 = vmatmul.f32.vlgmr.msrb.gmra.mxu3 %v1218_v7  ;;  %v1219_v10 = vand.u32 4294901760, %v1218_v7 }
 0x41f   :  { %1821 = vmatpush.msrb.mxu3 %v3034_v23  ;;  %1771 = vmatpush.msrb.mxu2 %v3051_v42 }
 0x420   :  { %1416 = vmatmul.f32.vlgmr.msra.gmra.mxu0 %v1219_v10  ;;  %v1220_v16 = vsub.f32 %v1218_v7, %v1219_v10  ;;  %v1685_v7 = vand.u32 4294901760, %v3081_v18  ;;  %v3095_v10 = vand.u32 4294901760, %v1617_v61 }
 0x421   :  { %1823 = vmatpush.msrb.mxu3 %v3042_v27  ;;  %1774 = vmatpush.msrb.mxu2 %v3066_v29 }
 0x422   :  { %v1221_v48 = vand.u32 4294901760, %v1220_v16  ;;  %v3099_v16 = vsub.f32 %v1618_v58, %v3085_v44  ;;  %1635 = vmatpush.msrb.mxu0 %v3095_v10  ;;  %v3198_v58 = vand.u32 4294901760, %v1610_v26 }
 0x423   :  { %1825 = vmatpush.msrb.mxu3 %v3053_v56  ;;  %1777 = vmatpush.msrb.mxu2 %v3081_v18 }
 0x424   :  { %1222 = vmatmul.f32.vlgmr.msrb.gmra.mxu1 %v1221_v48  ;;  %1522 = vmatmul.f32.vlgmr.msra.gmra.mxu2 %v1217_v32  ;;  %v1616_v48 = vld [vmem:[%s3311_s4 + $0x48] sm:$0xff] }
 0x425   :  { %1827 = vmatpush.msrb.mxu3 %v3068_v55  ;;  %1670 = vmatpush.msrb.mxu1 %v1669_v12 }
 0x426   :  { %1780 = vmatpush.msrb.mxu2 %v3099_v16 }
 0x427   :  { %1829 = vmatpush.msrb.mxu3 %v3085_v44  ;;  %1676 = vmatpush.msrb.mxu1 %v1675_v54 }
 0x429   :  { %1831 = vmatpush.msrb.mxu3 %v3095_v10 }
 0x42c   :  { %1485 = vmatmul.f32.vlgmr.msra.gmra.mxu1 %v1217_v32  ;;  %v1680_v32 = vsub.f32 %v3066_v29, %v1679_v8 }
 0x49d   :  { %v1417_v9 = vpop.f32.mrf.mxu0 }
 0x49f   :  { %v1324_v30 = vpop.f32.mrf.mxu2 }
 0x4a1   :  { %v1223_v33 = vpop.f32.mrf.mxu1  ;;  %v1378_v51 = vpop.f32.mrf.mxu3 }
 0x4a2   :  { %v1224_v35 = vadd.f32 %v1223_v33, %v1184_v28  ;;  %v1681_v28 = vand.u32 4294901760, %v1680_v32  ;;  %v3110_v33 = vsub.f32 %v1617_v61, %v3095_v10  ;;  %v3214_v32 = vsub.f32 %v1610_v26, %v3198_v58 }
 0x4a4   :  { %v1325_v38 = vadd.f32 %v1324_v30, %v1224_v35  ;;  %v1686_v30 = vsub.f32 %v3081_v18, %v1685_v7  ;;  %v3112_v35 = vand.u32 4294901760, %v1616_v48  ;;  %1682 = vmatpush.msrb.mxu1 %v1681_v28  ;;  %1783 = vmatpush.msrb.mxu2 %v3110_v33 }
 0x4a6   :  { %v1379_v63 = vadd.f32 %v1378_v51, %v1325_v38  ;;  %v1691_v38 = vand.u32 4294901760, %v3099_v16  ;;  %v1615_v51 = vld [vmem:[%s3311_s4 + $0x40] sm:$0xff]  ;;  %1637 = vmatpush.msrb.mxu0 %v3112_v35  ;;  %1833 = vmatpush.msrb.mxu3 %v3112_v35 }
 0x4a7   :  { %v1523_v5 = vpop.f32.mrf.mxu2 }
 0x4a8   :  { %v1418_v36 = vadd.f32 %v1417_v9, %v1379_v63  ;;  %v1687_v63 = vand.u32 4294901760, %v1686_v30  ;;  %v1697_v9 = vand.u32 4294901760, %v3110_v33  ;;  %v1608_v30 = vld [vmem:[%s3311_s4 + $0x8] sm:$0xff] }
 0x4a9   :  { %v1486_v4 = vpop.f32.mrf.mxu1 }
 0x4aa   :  { %v1487_v1 = vadd.f32 %v1486_v4, %v1418_v36  ;;  %v3122_v36 = vsub.f32 %v1616_v48, %v3112_v35  ;;  %v3124_v4 = vand.u32 4294901760, %v1615_v51  ;;  %1688 = vmatpush.msrb.mxu1 %v1687_v63  ;;  %v3216_v48 = vand.u32 4294901760, %v1609_v6 }
 0x4ac   :  { %v3022_v24 = vadd.f32 %v1523_v5, %v1487_v1  ;;  %v1692_v1 = vsub.f32 %v3099_v16, %v1691_v38  ;;  %v1614_v5 = vld [vmem:[%s3311_s4 + $0x38] sm:$0xff]  ;;  %1639 = vmatpush.msrb.mxu0 %v3124_v4  ;;  %1786 = vmatpush.msrb.mxu2 %v3122_v36 }
 0x4ad   :  { %1835 = vmatpush.msrb.mxu3 %v3124_v4 }
 0x4ae   :  { %v1526_v60 = vsel %vm229_vm1, %v3022_v24, 0.0  ;;  %v1533_v53 = vmul.f32 %v3022_v24, %v3022_v24 }
 0x4af   :  { %v1527_v39 = vrot.slane %v1526_v60, 4 }
 0x4b0   :  { %v1534_v0 = vsel %vm229_vm1, %v1533_v53, 0.0  ;;  %v1703_v53 = vand.u32 4294901760, %v3122_v36 }
 0x4b1   :  { %v1528_v25 = vadd.f32 %v1527_v39, %v1526_v60  ;;  %v1535_v40 = vrot.slane %v1534_v0, 4  ;;  %v1698_v60 = vsub.f32 %v3110_v33, %v1697_v9  ;;  %v3140_v39 = vsub.f32 %v1615_v51, %v3124_v4 }
 0x4b2   :  { %v1594_v33 = vperm.slane %v3012_v59, 3 }
 0x4b3   :  { %v1529_v43 = vrot.slane %v1528_v25, 2  ;;  %v1536_v62 = vadd.f32 %v1535_v40, %v1534_v0  ;;  %v3142_v0 = vand.u32 4294901760, %v1614_v5  ;;  %v1613_v40 = vld [vmem:[%s3311_s4 + $0x30] sm:$0xff]  ;;  %1789 = vmatpush.msrb.mxu2 %v3140_v39 }
 0x4b5   :  { %v1530_v50 = vadd.f32 %v1529_v43, %v1528_v25  ;;  %v1537_v2 = vrot.slane %v1536_v62, 2  ;;  %v1693_v25 = vand.u32 4294901760, %v1692_v1  ;;  %v1699_v43 = vand.u32 4294901760, %v1698_v60  ;;  %1641 = vmatpush.msrb.mxu0 %v3142_v0  ;;  %1837 = vmatpush.msrb.mxu3 %v3142_v0 }
 0x4b6   :  { %v1739_v1 = vand.u32 4294901760, %v3214_v32  ;;  %v3233_v60 = vand.u32 4294901760, %v1608_v30 }
 0x4b7   :  { %v1531_v13 = vrot.slane %v1530_v50, 1  ;;  %v1538_v11 = vadd.f32 %v1537_v2, %v1536_v62  ;;  %v1704_v62 = vsub.f32 %v3122_v36, %v1703_v53  ;;  %v3155_v2 = vsub.f32 %v1614_v5, %v3142_v0  ;;  %1694 = vmatpush.msrb.mxu1 %v1693_v25  ;;  %v1607_v25 = vld [vmem:[%s3311_s4] sm:$0xff] }
 0x4b8   :  { %v3229_v5 = vsub.f32 %v1609_v6, %v3216_v48 }
 0x4b9   :  { %v1539_v19 = vrot.slane %v1538_v11, 1  ;;  %v1532_v45 = vadd.f32 %v1531_v13, %v1530_v50  ;;  %v1709_v50 = vand.u32 4294901760, %v3140_v39  ;;  %v3158_v13 = vand.u32 4294901760, %v1613_v40  ;;  %1700 = vmatpush.msrb.mxu1 %v1699_v43  ;;  %1792 = vmatpush.msrb.mxu2 %v3155_v2 }
 0x4ba   :  { %v1740_v43 = vsub.f32 %v3214_v32, %v1739_v1 }
 0x4bb   :  { %v1540_v20 = vadd.f32 %v1539_v19, %v1538_v11  ;;  %v1612_v11 = vld [vmem:[%s3311_s4 + $0x28] sm:$0xff]  ;;  %v1705_v19 = vand.u32 4294901760, %v1704_v62  ;;  %1643 = vmatpush.msrb.mxu0 %v3158_v13  ;;  %1839 = vmatpush.msrb.mxu3 %v3158_v13  ;;  %v1745_v62 = vand.u32 4294901760, %v3229_v5 }
 0x4bd   :  { %v1541_v21 = vsel %vm245_vm2, %v1532_v45, %v1540_v20  ;;  %v1710_v45 = vsub.f32 %v3140_v39, %v1709_v50  ;;  %v1715_v20 = vand.u32 4294901760, %v3155_v2  ;;  %1706 = vmatpush.msrb.mxu1 %v1705_v19  ;;  %v1750_v19 = vsub.f32 %v1608_v30, %v3233_v60 }
 0x4be   :  { %v1542_v22 = vmul.f32 0.03125, %v1541_v21  ;;  %v3168_v21 = vand.u32 4294901760, %v1612_v11 }
 0x4c0   :  { %v1543_v14 = vpack.c.bf16 %v1542_v22, %v1542_v22  ;;  %1645 = vmatpush.msrb.mxu0 %v3168_v21  ;;  %1841 = vmatpush.msrb.mxu3 %v3168_v21 }
 0x4c2   :  { %v1544_v34 = vunpack.c.l.bf16 %v1543_v14  ;;  %v1611_v14 = vld [vmem:[%s3311_s4 + $0x20] sm:$0xff] }
 0x4c4   :  { %v1545_v46 = vsub.f32 %v1542_v22, %v1544_v34  ;;  %v3173_v22 = vsub.f32 %v1613_v40, %v3158_v13 }
 0x4c6   :  { %v1547_v15 = vrot.slane %v1545_v46, 6  ;;  %v1716_v46 = vsub.f32 %v3155_v2, %v1715_v20  ;;  %v1721_v37 = vand.u32 4294901760, %v3173_v22  ;;  %1795 = vmatpush.msrb.mxu2 %v3173_v22 }
 0x4c8   :  { %v1549_v41 = vsel %vm229_vm1, %v1544_v34, %v1547_v15  ;;  %v1711_v34 = vand.u32 4294901760, %v1710_v45  ;;  %v3183_v15 = vsub.f32 %v1612_v11, %v3168_v21  ;;  %v1717_v49 = vand.u32 4294901760, %v1716_v46 }
 0x4c9   :  { %1566 = vmatmul.f32.vlgmr.msra.gmra.mxu3 %v1549_v41  ;;  %v3185_v41 = vand.u32 4294901760, %v1611_v14  ;;  %v1722_v12 = vsub.f32 %v3173_v22, %v1721_v37  ;;  %v3243_v11 = vand.u32 4294901760, %v1607_v25  ;;  %v1741_v45 = vand.u32 4294901760, %v1740_v43 }
 0x4ca   :  { %v1727_v31 = vand.u32 4294901760, %v3183_v15  ;;  %1712 = vmatpush.msrb.mxu1 %v1711_v34  ;;  %1798 = vmatpush.msrb.mxu2 %v3183_v15  ;;  %v1751_v46 = vand.u32 4294901760, %v1750_v19 }
 0x4cb   :  { %v3196_v3 = vsub.f32 %v1611_v14, %v3185_v41  ;;  %1647 = vmatpush.msrb.mxu0 %v3185_v41  ;;  %1843 = vmatpush.msrb.mxu3 %v3185_v41  ;;  %v1723_v28 = vand.u32 4294901760, %v1722_v12  ;;  %v1746_v14 = vsub.f32 %v3229_v5, %v1745_v62  ;;  %v1756_v34 = vsub.f32 %v1607_v25, %v3243_v11 }
 0x4cc   :  { %v1728_v61 = vsub.f32 %v3183_v15, %v1727_v31  ;;  %1718 = vmatpush.msrb.mxu1 %v1717_v49  ;;  %v1752_v12 = vsub.f32 %v1750_v19, %v1751_v46 }
 0x4cd   :  { %v1733_v54 = vand.u32 4294901760, %v3196_v3  ;;  %1649 = vmatpush.msrb.mxu0 %v3198_v58  ;;  %1801 = vmatpush.msrb.mxu2 %v3196_v3  ;;  %v1747_v26 = vand.u32 4294901760, %v1746_v14  ;;  %v1757_v49 = vand.u32 4294901760, %v1756_v34 }
 0x4ce   :  { %v1729_v51 = vand.u32 4294901760, %v1728_v61  ;;  %1845 = vmatpush.msrb.mxu3 %v3198_v58  ;;  %1724 = vmatpush.msrb.mxu1 %v1723_v28  ;;  %v1753_v61 = vand.u32 4294901760, %v1752_v12 }
 0x4cf   :  { %v1734_v63 = vsub.f32 %v3196_v3, %v1733_v54  ;;  %1651 = vmatpush.msrb.mxu0 %v3216_v48  ;;  %1804 = vmatpush.msrb.mxu2 %v3214_v32  ;;  %v1758_v6 = vsub.f32 %v1756_v34, %v1757_v49 }
 0x4d0   :  { %1847 = vmatpush.msrb.mxu3 %v3216_v48  ;;  %1730 = vmatpush.msrb.mxu1 %v1729_v51 }
 0x4d1   :  { %v1735_v40 = vand.u32 4294901760, %v1734_v63  ;;  %1653 = vmatpush.msrb.mxu0 %v3233_v60  ;;  %1807 = vmatpush.msrb.mxu2 %v3229_v5  ;;  %v1759_v30 = vand.u32 4294901760, %v1758_v6 }
 0x4d2   :  { %1849 = vmatpush.msrb.mxu3 %v3233_v60 }
 0x4d3   :  { %1736 = vmatpush.msrb.mxu1 %v1735_v40  ;;  %1655 = vmatpush.msrb.mxu0 %v3243_v11 }
 0x4d4   :  { %1810 = vmatpush.msrb.mxu2 %v1750_v19  ;;  %1851 = vmatpush.msrb.mxu3 %v3243_v11 }
 0x4d5   :  { %1862 = vmatpush.msra.mxu0 %v1667_v57  ;;  %1742 = vmatpush.msrb.mxu1 %v1741_v45 }
 0x4d6   :  { %1813 = vmatpush.msrb.mxu2 %v1756_v34 }
 0x4d7   :  { %1866 = vmatpush.msra.mxu0 %v1673_v52  ;;  %1748 = vmatpush.msrb.mxu1 %v1747_v26 }
 0x4d9   :  { %1870 = vmatpush.msra.mxu0 %v1679_v8  ;;  %1754 = vmatpush.msrb.mxu1 %v1753_v61 }
 0x4db   :  { %1874 = vmatpush.msra.mxu0 %v1685_v7  ;;  %1760 = vmatpush.msrb.mxu1 %v1759_v30 }
 0x4dd   :  { %1929 = vmatpush.msra.mxu1 %v3034_v23  ;;  %1878 = vmatpush.msra.mxu0 %v1691_v38  ;;  %v1596_v38 = vperm.slane %v3018_v17, 3 }
 0x4df   :  { %1931 = vmatpush.msra.mxu1 %v3042_v27  ;;  %1882 = vmatpush.msra.mxu0 %v1697_v9 }
 0x4e1   :  { %1933 = vmatpush.msra.mxu1 %v3053_v56  ;;  %1886 = vmatpush.msra.mxu0 %v1703_v53 }
 0x4e3   :  { %1935 = vmatpush.msra.mxu1 %v3068_v55  ;;  %1890 = vmatpush.msra.mxu0 %v1709_v50 }
 0x4e5   :  { %1937 = vmatpush.msra.mxu1 %v3085_v44  ;;  %1894 = vmatpush.msra.mxu0 %v1715_v20 }
 0x4e7   :  { %1939 = vmatpush.msra.mxu1 %v3095_v10  ;;  %1898 = vmatpush.msra.mxu0 %v1721_v37 }
 0x4e9   :  { %1941 = vmatpush.msra.mxu1 %v3112_v35  ;;  %1902 = vmatpush.msra.mxu0 %v1727_v31 }
 0x4eb   :  { %1943 = vmatpush.msra.mxu1 %v3124_v4  ;;  %1906 = vmatpush.msra.mxu0 %v1733_v54 }
 0x4ed   :  { %1945 = vmatpush.msra.mxu1 %v3142_v0  ;;  %1910 = vmatpush.msra.mxu0 %v1739_v1 }
 0x4ef   :  { %1947 = vmatpush.msra.mxu1 %v3158_v13  ;;  %1914 = vmatpush.msra.mxu0 %v1745_v62 }
 0x4f1   :  { %1949 = vmatpush.msra.mxu1 %v3168_v21  ;;  %1918 = vmatpush.msra.mxu0 %v1751_v46 }
 0x4f3   :  { %1951 = vmatpush.msra.mxu1 %v3185_v41  ;;  %1922 = vmatpush.msra.mxu0 %v1757_v49  ;;  %v1623_v41 = vld [vmem:[%s3312_s5] sm:$0x1] }
 0x4f5   :  { %1953 = vmatpush.msra.mxu1 %v3198_v58 }
 0x4f7   :  { %1955 = vmatpush.msra.mxu1 %v3216_v48 }
 0x4f9   :  { %1957 = vmatpush.msra.mxu1 %v3233_v60 }
 0x4fb   :  { %1959 = vmatpush.msra.mxu1 %v3243_v11 }
 0x54c   :  { %v1567_v28 = vpop.f32.mrf.mxu3 }
 0x54d   :  { %v1571_v51 = vrot.slane %v1567_v28, 2 }
 0x54f   :  { %v1573_v47 = vadd.f32 %v1571_v51, %v1567_v28 }
 0x551   :  { %v1574_v57 = vmul.f32 %v1573_v47, %v1573_v47  ;;  %v1579_v18 = vperm.slane %v1573_v47, 0 }
 0x553   :  { %v1576_v42 = vrot.slane %v1574_v57, 7  ;;  %v1580_v10 = vsub.f32 %v3022_v24, %v1579_v18 }
 0x555   :  { %v1578_v52 = vsub.f32 %v1573_v47, %v1576_v42 }
 0x557   :  { %v1581_v23 = vadd.f32 1e-05, %v1578_v52 }
 0x559   :  { %1996 = vrsqrt.f32 %v1581_v23  ;;  %vm1588_vm13 = vweird.f32 %v1581_v23 }
 0x55f   :  { %v1997_v27 = vpop.eup %1996 }
 0x560   :  { %v1583_v56 = vmul.f32 %v1997_v27, %v1581_v23  ;;  %vm1589_vm12 = vweird.f32 %v1997_v27 }
 0x561   :  { %vm1590_vm14 = vmor %vm1588_vm13, %vm1589_vm12 }
 0x562   :  { %v1584_v29 = vmul.f32 %v1997_v27, %v1583_v56 }
 0x564   :  { %v1585_v55 = vmul.f32 0.5, %v1584_v29 }
 0x566   :  { %v1586_v8 = vsub.f32 1.5, %v1585_v55 }
 0x568   :  { %v1587_v44 = vmul.f32 %v1997_v27, %v1586_v8 }
 0x56a   :  { %v1591_v7 = vsel %vm1590_vm14, %v1997_v27, %v1587_v44 }
 0x56b   :  { %v1592_v16 = vperm.slane %v1591_v7, 1 }
 0x56d   :  { %v1593_v35 = vmul.f32 %v1592_v16, %v1580_v10 }
 0x56f   :  { %v1595_v9 = vmul.f32 %v1594_v33, %v1593_v35 }
 0x571   :  { %v1597_v36 = vadd.f32 %v1596_v38, %v1595_v9 }
 0x573   :  { %v1598_v4 = vmax.f32 %v1597_v36, 0.0 }
 0x575   :  { %v1599_v53 = vsel %vm229_vm1, %v1598_v4, 0.0 }
 0x576   :  { %v1600_v39 = vrot.slane %v1599_v53, 4 }
 0x578   :  { %v1601_v0 = vadd.f32 %v1600_v39, %v1599_v53 }
 0x57a   :  { %v1602_v50 = vrot.slane %v1601_v0, 2 }
 0x57c   :  { %v1603_v2 = vadd.f32 %v1602_v50, %v1601_v0 }
 0x57e   :  { %v1604_v24 = vrot.slane %v1603_v2, 1 }
 0x580   :  { %v1605_v13 = vadd.f32 %v1604_v24, %v1603_v2 }
 0x582   :  { %v1606_v20 = vmul.f32 0.5, %v1605_v13 }
 0x584   :  { %v1656_v59 = vand.u32 4294901760, %v1606_v20 }
 0x586   :  { %1762 = vmatmul.f32.vlgmr.msrb.gmra.mxu1 %v1656_v59  ;;  %v1657_v21 = vsub.f32 %v1606_v20, %v1656_v59 }
 0x588   :  { %1816 = vmatmul.f32.vlgmr.msrb.gmra.mxu2 %v1657_v21  ;;  %v1658_v22 = vand.u32 4294901760, %v1657_v21 }
 0x58a   :  { %1855 = vmatmul.f32.vlgmr.msrb.gmra.mxu3 %v1658_v22  ;;  %v1659_v17 = vsub.f32 %v1657_v21, %v1658_v22 }
 0x58c   :  { %v1660_v15 = vand.u32 4294901760, %v1659_v17 }
 0x58e   :  { %1661 = vmatmul.f32.vlgmr.msrb.gmra.mxu0 %v1660_v15  ;;  %1961 = vmatmul.f32.vlgmr.msra.gmra.mxu1 %v1656_v59 }
 0x596   :  { %1924 = vmatmul.f32.vlgmr.msra.gmra.mxu0 %v1656_v59 }
 0x603   :  { %v1763_v37 = vpop.f32.mrf.mxu1 }
 0x60b   :  { %v1662_v31 = vpop.f32.mrf.mxu0  ;;  %v1817_v54 = vpop.f32.mrf.mxu2 }
 0x60c   :  { %v1663_v3 = vadd.f32 %v1662_v31, %v1623_v41  ;;  %v1962_v60 = vpop.f32.mrf.mxu1 }
 0x60d   :  { %v1856_v48 = vpop.f32.mrf.mxu3 }
 0x60e   :  { %v1764_v58 = vadd.f32 %v1763_v37, %v1663_v3 }
 0x610   :  { %v1818_v32 = vadd.f32 %v1817_v54, %v1764_v58 }
 0x612   :  { %v1857_v63 = vadd.f32 %v1856_v48, %v1818_v32 }
 0x613   :  { %v1925_v1 = vpop.f32.mrf.mxu0 }
 0x614   :  { %v1926_v5 = vadd.f32 %v1925_v1, %v1857_v63 }
 0x616   :  { %v1963_v25 = vadd.f32 %v1962_v60, %v1926_v5 }
 0x618   :  { %1966 = vst.msk [vmem:[#allocation5] sm:$0x1] %vm1965_vm15, %v1963_v25 }
 0x619   :  { %1977 = dma.vmem_to_hbm [thread:$0]  %s1973_s24, 16, %s1975_s27, [#allocation4]  }
 0x61a   :  { %2067 = dma.done.wait [#allocation4], 16  }
 0x61b   :  { %2068 = vsyncadd [#allocation4], 4294967280 }
 0x61c   :  { %1982 = vsyncpa [#allocation3], 1 }
 0x61d   :  { %1983 = vsyncpa [#allocation4], 1 }

</bundles_post_ra>
